<compile_context>
chip_gen: v7x
topology: tpu7x:2x2x1
jax: 0.10.0
libtpu: 0.0.40
codegen_flags: <defaults>
</compile_context>

<pallas_src>
import functools
import math

import jax
import jax.numpy as jnp
from jax import lax
from jax.experimental import pallas as pl
from jax.experimental.pallas import tpu as pltpu

# scipy.signal.windows.gaussian(5, std=1.0) (NOT normalized), exactly the values
# the PyTorch __init__ copies into the conv weights.
_GAUSS = tuple(math.exp(-0.5 * float(k - 2) ** 2) for k in range(5))
_SOBEL = ((1.0, 0.0, -1.0),
          (2.0, 0.0, -2.0),
          (1.0, 0.0, -1.0))

_ROW0 = 8          # sublane-aligned start row of each scratch interior
_HALO_ROWS = 8     # full 8-row halo strips (aligned, unmasked stores)


def _edge_kernel(x_ref, o_ref, pad_h_ref, pad_b_ref, *, w_valid):
    """x_ref/o_ref: (NP, H, W) blocks. pad_*_ref: (H + 16, W) f32 VMEM scratch."""
    NP, H, W = x_ref.shape

    # ---- hoisted (1, W) lane-index masks for horizontal shifts ---------------
    col = lax.broadcasted_iota(jnp.int32, (1, W), 1)
    hmask = {d: (col < W - d) if d > 0 else (col >= -d)
             for d in (-2, -1, 1, 2)}
    valid = (col < w_valid) if w_valid < W else None     # lane-padding mask

    def hshift(a, d):
        # out[i, j] = a[i, j + d] (cross-correlation tap), zero outside [0, W).
        if d == 0:
            return a
        rolled = pltpu.roll(a, (-d) % W, 1)              # XLU lane rotation
        return jnp.where(hmask[d], rolled, 0.0)          # (1,W) mask broadcast

    # ---- zero the full 8-row halo strips once per grid step ------------------
    # Interiors are fully overwritten per plane below; halos stay zero across
    # the per-plane loop, so this runs once per grid step (unconditional ->
    # megacore safe; 8-row aligned -> unmasked vst).
    zeros8 = jnp.zeros((_HALO_ROWS, W), jnp.float32)
    for ref in (pad_h_ref, pad_b_ref):
        ref[0:_ROW0, :] = zeros8
        ref[_ROW0 + H:_ROW0 + H + _HALO_ROWS, :] = zeros8

    def vtap(ref, d):
        # scratch interior shifted by d rows, zero (halo) outside the image
        return ref[_ROW0 + d:_ROW0 + d + H, :]

    def per_plane(p):
        x = x_ref[p].astype(jnp.float32)                 # (H, W)

        # ---- gaussian blur, horizontal (1x5 kernel, padding (0, 2)) ----------
        blur_h = _GAUSS[0] * hshift(x, -2)
        for k in range(1, 5):
            blur_h = blur_h + _GAUSS[k] * hshift(x, k - 2)

        # ---- gaussian blur, vertical (5x1 kernel, padding (2, 0)) ------------
        pad_h_ref[_ROW0:_ROW0 + H, :] = blur_h           # aligned interior store
        blur = _GAUSS[0] * vtap(pad_h_ref, -2)
        for k in range(1, 5):
            blur = blur + _GAUSS[k] * vtap(pad_h_ref, k - 2)

        if valid is not None:
            # nn.Conv2d zero-pads the *truncated* blurred image: re-zero the
            # lane-padding columns so the sobel taps see the same zeros.
            blur = jnp.where(valid, blur, 0.0)

        # ---- sobel x / y (3x3 'same' convs), exact separable form ------------
        # Second scratch: the blur store does not WAR-hazard the gaussian loads.
        pad_b_ref[_ROW0:_ROW0 + H, :] = blur
        b_up = vtap(pad_b_ref, -1)                       # blur[i-1, j] (zero pad)
        b_dn = vtap(pad_b_ref, +1)                       # blur[i+1, j] (zero pad)
        vs = b_up + 2.0 * blur + b_dn                    # vertical [1, 2, 1]
        vd = b_up - b_dn                                 # vertical [1, 0, -1]

        grad_x = hshift(vs, -1) - hshift(vs, +1)         # horizontal [1, 0, -1]
        grad_y = hshift(vd, -1) + 2.0 * vd + hshift(vd, +1)   # horizontal [1, 2, 1]

        # ---- magnitude + per-plane max normalization --------------------------
        grad_mag = jnp.sqrt(grad_x * grad_x + grad_y * grad_y + 1e-8)
        if valid is not None:
            grad_mag = jnp.where(valid, grad_mag, 0.0)   # keep padding out of max
        inv_max = 1.0 / jnp.max(grad_mag)                # exact divide (tolerance)
        o_ref[p] = (grad_mag * inv_max).astype(o_ref.dtype)

    if NP == 1:
        per_plane(0)
    else:
        pl.loop(0, NP)(per_plane)                        # scf.for over the planes


def _choose_num_planes(n, plane_bytes, scratch_bytes, cap_bytes):
    """Largest planes-per-grid-step that divides n, keeps >= 2 grid steps when
    possible (v7x dual-TensorCore sharding of the parallel axis) and fits the
    VMEM budget (double-buffered in/out blocks + two scratches + margin)."""
    for cand in (8, 4, 2, 1):
        if n % cand:
            continue
        if n >= 2 and n // cand < 2:
            continue
        need = 4 * cand * plane_bytes + 2 * scratch_bytes + (4 << 20)
        if need <= cap_bytes:
            return cand
    return 1


def edge_detector(img):
    """img: (B, C, H, W) float array -> normalized edge magnitude, same shape."""
    B, C, H, W = img.shape
    N = B * C
    x3 = img.reshape(N, H, W)      # free reshape of contiguous leading dims

    # Pad the lane axis to a multiple of 128: lane-dense (unmasked) output
    # stores and full-vreg rolls/selects; cropped after the kernel.
    W_pad = ((W + 127) // 128) * 128
    if W_pad != W:
        x3 = jnp.pad(x3, ((0, 0), (0, 0), (0, W_pad - W)))

    itemsize = jnp.dtype(img.dtype).itemsize
    plane_bytes = H * W_pad * itemsize
    scratch_bytes = (H + 16) * W_pad * 4

    # VMEM cap: physical capacity minus headroom for compiler-internal scratch;
    # this yields ~48 MiB on v7x (64 MiB physical) and ~112 MiB on v5e/v6e.
    try:
        phys = int(pltpu.get_tpu_info().vmem_capacity_bytes)
    except Exception:
        phys = 64 * 1024 * 1024                          # conservative (v7x)
    cap = max(32 * 1024 * 1024, phys - 16 * 1024 * 1024)

    NP = _choose_num_planes(N, plane_bytes, scratch_bytes, cap)
    need = 4 * NP * plane_bytes + 2 * scratch_bytes + (4 << 20)
    vmem_limit = int(min(cap, max(32 * 1024 * 1024, need)))
    # TODO(synk): planes where even NP=1 exceeds `cap` need a row-tiled grid
    # (overlapping TH+4-row input blocks, per-tile max then a rescale pass);
    # not needed at demo sizes.

    kernel = functools.partial(_edge_kernel, w_valid=W)
    out3 = pl.pallas_call(
        kernel,
        out_shape=jax.ShapeDtypeStruct((N, H, W_pad), img.dtype),
        grid_spec=pltpu.PrefetchScalarGridSpec(
            num_scalar_prefetch=0,
            grid=(N // NP,),                             # single parallel axis
            in_specs=[pl.BlockSpec((NP, H, W_pad), lambda n: (n, 0, 0))],
            out_specs=pl.BlockSpec((NP, H, W_pad), lambda n: (n, 0, 0)),
            scratch_shapes=[pltpu.VMEM((H + 16, W_pad), jnp.float32),
                            pltpu.VMEM((H + 16, W_pad), jnp.float32)],
        ),
        compiler_params=pltpu.CompilerParams(
            dimension_semantics=("parallel",),
            vmem_limit_bytes=vmem_limit,
        ),
    )(x3)

    if W_pad != W:
        out3 = out3[:, :, :W]
    return out3.reshape(B, C, H, W)


# ---------------------------------------------------------------------------
# Pure-JAX reference (same math as the PyTorch module) for a correctness check.
def _edge_reference(img):
    B, C, H, W = img.shape
    x = img.astype(jnp.float32)

    def conv_same(x4, offsets_weights):
        # offsets_weights: list of ((dy, dx), w); zero 'same' padding
        xp = jnp.pad(x4, ((0, 0), (0, 0), (2, 2), (2, 2)))
        out = jnp.zeros_like(x4)
        for (dy, dx), w in offsets_weights:
            out = out + w * xp[:, :, 2 + dy:2 + dy + H, 2 + dx:2 + dx + W]
        return out

    blur_h = conv_same(x, [((0, k - 2), _GAUSS[k]) for k in range(5)])
    blur = conv_same(blur_h, [((k - 2, 0), _GAUSS[k]) for k in range(5)])
    gx = conv_same(blur, [((a - 1, b - 1), _SOBEL[a][b])
                          for a in range(3) for b in range(3)])
    gy = conv_same(blur, [((a - 1, b - 1), _SOBEL[b][a])
                          for a in range(3) for b in range(3)])
    mag = jnp.sqrt(gx ** 2 + gy ** 2 + 1e-8)
    mag_max = jnp.max(mag.reshape(B, C, -1), axis=2)[:, :, None, None]
    return mag / mag_max


def _check(shape, key):
    img = jax.random.uniform(key, shape, dtype=jnp.float32)
    out = jax.block_until_ready(edge_detector(img))
    ref = _edge_reference(img)
    assert out.shape == shape
    assert jnp.allclose(out, ref, atol=1e-5, rtol=1e-5), f"mismatch at {shape}"


if __name__ == "__main__":
    root = jax.random.PRNGKey(0)
    k1, k2, k3 = jax.random.split(root, 3)

    # (BS, 1, H, W) like the module; lane-aligned width -> NP=1, 2 grid steps.
    _check((2, 1, 128, 128), k1)
    # Multi-plane batching path: N=8 -> 4 planes per grid step, 2 grid steps.
    _check((2, 4, 64, 128), k2)
    # Non-multiple-of-128 width -> lane padding + masked max + crop path.
    _check((1, 3, 64, 96), k3)

    print("KERNEL_OK")
</pallas_src>

<mosaic_0001>
module attributes {stable_mosaic.version = 11 : i64} {
  func.func @_edge_kernel(%arg0: i32, %arg1: memref<1x128x128xf32, #tpu.memory_space<vmem>>, %arg2: memref<1x128x128xf32, #tpu.memory_space<vmem>>, %arg3: memref<144x128xf32, #tpu.memory_space<vmem>>, %arg4: memref<144x128xf32, #tpu.memory_space<vmem>>) attributes {dimension_semantics = [#tpu.dimension_semantics<parallel>], iteration_bounds = array<i64: 2>, scalar_prefetch = 0 : i64, scratch_operands = 2 : i64, tpu.core_type = #tpu.core_type<tc>, window_params = [{transform_indices = @transform_0, window_bounds = array<i64: 1, 128, 128>}, {transform_indices = @transform_1, window_bounds = array<i64: 1, 128, 128>}]} {
    %0 = tpu.iota {dimensions = array<i32: 1>} : vector<1x128xi32>
    %c2_i32 = arith.constant 2 : i32
    %1 = vector.broadcast %c2_i32 : i32 to vector<1x128xi32>
    %2 = arith.cmpi sge, %0, %1 : vector<1x128xi32>
    %c1_i32 = arith.constant 1 : i32
    %3 = vector.broadcast %c1_i32 : i32 to vector<1x128xi32>
    %4 = arith.cmpi sge, %0, %3 : vector<1x128xi32>
    %c127_i32 = arith.constant 127 : i32
    %5 = vector.broadcast %c127_i32 : i32 to vector<1x128xi32>
    %6 = arith.cmpi slt, %0, %5 : vector<1x128xi32>
    %c126_i32 = arith.constant 126 : i32
    %7 = vector.broadcast %c126_i32 : i32 to vector<1x128xi32>
    %8 = arith.cmpi slt, %0, %7 : vector<1x128xi32>
    %cst = arith.constant 0.000000e+00 : f32
    %9 = vector.broadcast %cst : f32 to vector<8x128xf32>
    %c0 = arith.constant 0 : index
    %c0_0 = arith.constant 0 : index
    %10 = vector.load %arg3[%c0, %c0_0] : memref<144x128xf32, #tpu.memory_space<vmem>>, vector<8x128xf32>
    tpu.vector_store %arg3[%c0, %c0_0], %9 {strides = array<i32>} : memref<144x128xf32, #tpu.memory_space<vmem>>, vector<8x128xf32>,
    %c136 = arith.constant 136 : index
    %c0_1 = arith.constant 0 : index
    %11 = vector.load %arg3[%c136, %c0_1] : memref<144x128xf32, #tpu.memory_space<vmem>>, vector<8x128xf32>
    tpu.vector_store %arg3[%c136, %c0_1], %9 {strides = array<i32>} : memref<144x128xf32, #tpu.memory_space<vmem>>, vector<8x128xf32>,
    %c0_2 = arith.constant 0 : index
    %c0_3 = arith.constant 0 : index
    %12 = vector.load %arg4[%c0_2, %c0_3] : memref<144x128xf32, #tpu.memory_space<vmem>>, vector<8x128xf32>
    tpu.vector_store %arg4[%c0_2, %c0_3], %9 {strides = array<i32>} : memref<144x128xf32, #tpu.memory_space<vmem>>, vector<8x128xf32>,
    %c136_4 = arith.constant 136 : index
    %c0_5 = arith.constant 0 : index
    %13 = vector.load %arg4[%c136_4, %c0_5] : memref<144x128xf32, #tpu.memory_space<vmem>>, vector<8x128xf32>
    tpu.vector_store %arg4[%c136_4, %c0_5], %9 {strides = array<i32>} : memref<144x128xf32, #tpu.memory_space<vmem>>, vector<8x128xf32>,
    %c0_6 = arith.constant 0 : index
    %c0_7 = arith.constant 0 : index
    %c0_8 = arith.constant 0 : index
    %14 = vector.load %arg1[%c0_6, %c0_7, %c0_8] : memref<1x128x128xf32, #tpu.memory_space<vmem>>, vector<1x128x128xf32>
    %15 = vector.shape_cast %14 : vector<1x128x128xf32> to vector<128x128xf32>
    %c2_i32_9 = arith.constant 2 : i32
    %16 = tpu.dynamic_rotate %15 by %c2_i32_9 dim 1 : vector<128x128xf32>, i32 -> vector<128x128xf32>
    %cst_10 = arith.constant 0.000000e+00 : f32
    %17 = vector.shape_cast %2 : vector<1x128xi1> to vector<1x128xi1>
    %18 = vector.broadcast %17 : vector<1x128xi1> to vector<128x128xi1>
    %19 = vector.broadcast %cst_10 : f32 to vector<128x128xf32>
    %20 = arith.select %18, %16, %19 : vector<128x128xi1>, vector<128x128xf32>
    %cst_11 = arith.constant 0.135335281 : f32
    %21 = vector.broadcast %cst_11 : f32 to vector<128x128xf32>
    %22 = arith.mulf %21, %20 : vector<128x128xf32>
    %c1_i32_12 = arith.constant 1 : i32
    %23 = tpu.dynamic_rotate %15 by %c1_i32_12 dim 1 : vector<128x128xf32>, i32 -> vector<128x128xf32>
    %cst_13 = arith.constant 0.000000e+00 : f32
    %24 = vector.shape_cast %4 : vector<1x128xi1> to vector<1x128xi1>
    %25 = vector.broadcast %24 : vector<1x128xi1> to vector<128x128xi1>
    %26 = vector.broadcast %cst_13 : f32 to vector<128x128xf32>
    %27 = arith.select %25, %23, %26 : vector<128x128xi1>, vector<128x128xf32>
    %cst_14 = arith.constant 0.606530666 : f32
    %28 = vector.broadcast %cst_14 : f32 to vector<128x128xf32>
    %29 = arith.mulf %28, %27 : vector<128x128xf32>
    %30 = arith.addf %22, %29 : vector<128x128xf32>
    %cst_15 = arith.constant 1.000000e+00 : f32
    %31 = vector.broadcast %cst_15 : f32 to vector<128x128xf32>
    %32 = arith.mulf %31, %15 : vector<128x128xf32>
    %33 = arith.addf %30, %32 : vector<128x128xf32>
    %c127_i32_16 = arith.constant 127 : i32
    %34 = tpu.dynamic_rotate %15 by %c127_i32_16 dim 1 : vector<128x128xf32>, i32 -> vector<128x128xf32>
    %cst_17 = arith.constant 0.000000e+00 : f32
    %35 = vector.shape_cast %6 : vector<1x128xi1> to vector<1x128xi1>
    %36 = vector.broadcast %35 : vector<1x128xi1> to vector<128x128xi1>
    %37 = vector.broadcast %cst_17 : f32 to vector<128x128xf32>
    %38 = arith.select %36, %34, %37 : vector<128x128xi1>, vector<128x128xf32>
    %cst_18 = arith.constant 0.606530666 : f32
    %39 = vector.broadcast %cst_18 : f32 to vector<128x128xf32>
    %40 = arith.mulf %39, %38 : vector<128x128xf32>
    %41 = arith.addf %33, %40 : vector<128x128xf32>
    %c126_i32_19 = arith.constant 126 : i32
    %42 = tpu.dynamic_rotate %15 by %c126_i32_19 dim 1 : vector<128x128xf32>, i32 -> vector<128x128xf32>
    %cst_20 = arith.constant 0.000000e+00 : f32
    %43 = vector.shape_cast %8 : vector<1x128xi1> to vector<1x128xi1>
    %44 = vector.broadcast %43 : vector<1x128xi1> to vector<128x128xi1>
    %45 = vector.broadcast %cst_20 : f32 to vector<128x128xf32>
    %46 = arith.select %44, %42, %45 : vector<128x128xi1>, vector<128x128xf32>
    %cst_21 = arith.constant 0.135335281 : f32
    %47 = vector.broadcast %cst_21 : f32 to vector<128x128xf32>
    %48 = arith.mulf %47, %46 : vector<128x128xf32>
    %49 = arith.addf %41, %48 : vector<128x128xf32>
    %c8 = arith.constant 8 : index
    %c0_22 = arith.constant 0 : index
    %50 = vector.load %arg3[%c8, %c0_22] : memref<144x128xf32, #tpu.memory_space<vmem>>, vector<128x128xf32>
    tpu.vector_store %arg3[%c8, %c0_22], %49 {strides = array<i32>} : memref<144x128xf32, #tpu.memory_space<vmem>>, vector<128x128xf32>,
    %c6 = arith.constant 6 : index
    %c0_23 = arith.constant 0 : index
    %51 = vector.load %arg3[%c6, %c0_23] : memref<144x128xf32, #tpu.memory_space<vmem>>, vector<128x128xf32>
    %cst_24 = arith.constant 0.135335281 : f32
    %52 = vector.broadcast %cst_24 : f32 to vector<128x128xf32>
    %53 = arith.mulf %52, %51 : vector<128x128xf32>
    %c7 = arith.constant 7 : index
    %c0_25 = arith.constant 0 : index
    %54 = vector.load %arg3[%c7, %c0_25] : memref<144x128xf32, #tpu.memory_space<vmem>>, vector<128x128xf32>
    %cst_26 = arith.constant 0.606530666 : f32
    %55 = vector.broadcast %cst_26 : f32 to vector<128x128xf32>
    %56 = arith.mulf %55, %54 : vector<128x128xf32>
    %57 = arith.addf %53, %56 : vector<128x128xf32>
    %c8_27 = arith.constant 8 : index
    %c0_28 = arith.constant 0 : index
    %58 = vector.load %arg3[%c8_27, %c0_28] : memref<144x128xf32, #tpu.memory_space<vmem>>, vector<128x128xf32>
    %cst_29 = arith.constant 1.000000e+00 : f32
    %59 = vector.broadcast %cst_29 : f32 to vector<128x128xf32>
    %60 = arith.mulf %59, %58 : vector<128x128xf32>
    %61 = arith.addf %57, %60 : vector<128x128xf32>
    %c9 = arith.constant 9 : index
    %c0_30 = arith.constant 0 : index
    %62 = vector.load %arg3[%c9, %c0_30] : memref<144x128xf32, #tpu.memory_space<vmem>>, vector<128x128xf32>
    %cst_31 = arith.constant 0.606530666 : f32
    %63 = vector.broadcast %cst_31 : f32 to vector<128x128xf32>
    %64 = arith.mulf %63, %62 : vector<128x128xf32>
    %65 = arith.addf %61, %64 : vector<128x128xf32>
    %c10 = arith.constant 10 : index
    %c0_32 = arith.constant 0 : index
    %66 = vector.load %arg3[%c10, %c0_32] : memref<144x128xf32, #tpu.memory_space<vmem>>, vector<128x128xf32>
    %cst_33 = arith.constant 0.135335281 : f32
    %67 = vector.broadcast %cst_33 : f32 to vector<128x128xf32>
    %68 = arith.mulf %67, %66 : vector<128x128xf32>
    %69 = arith.addf %65, %68 : vector<128x128xf32>
    %c8_34 = arith.constant 8 : index
    %c0_35 = arith.constant 0 : index
    %70 = vector.load %arg4[%c8_34, %c0_35] : memref<144x128xf32, #tpu.memory_space<vmem>>, vector<128x128xf32>
    tpu.vector_store %arg4[%c8_34, %c0_35], %69 {strides = array<i32>} : memref<144x128xf32, #tpu.memory_space<vmem>>, vector<128x128xf32>,
    %c7_36 = arith.constant 7 : index
    %c0_37 = arith.constant 0 : index
    %71 = vector.load %arg4[%c7_36, %c0_37] : memref<144x128xf32, #tpu.memory_space<vmem>>, vector<128x128xf32>
    %c9_38 = arith.constant 9 : index
    %c0_39 = arith.constant 0 : index
    %72 = vector.load %arg4[%c9_38, %c0_39] : memref<144x128xf32, #tpu.memory_space<vmem>>, vector<128x128xf32>
    %cst_40 = arith.constant 2.000000e+00 : f32
    %73 = vector.broadcast %cst_40 : f32 to vector<128x128xf32>
    %74 = arith.mulf %73, %69 : vector<128x128xf32>
    %75 = arith.addf %71, %74 : vector<128x128xf32>
    %76 = arith.addf %75, %72 : vector<128x128xf32>
    %77 = arith.subf %71, %72 : vector<128x128xf32>
    %c1_i32_41 = arith.constant 1 : i32
    %78 = tpu.dynamic_rotate %76 by %c1_i32_41 dim 1 : vector<128x128xf32>, i32 -> vector<128x128xf32>
    %cst_42 = arith.constant 0.000000e+00 : f32
    %79 = vector.shape_cast %4 : vector<1x128xi1> to vector<1x128xi1>
    %80 = vector.broadcast %79 : vector<1x128xi1> to vector<128x128xi1>
    %81 = vector.broadcast %cst_42 : f32 to vector<128x128xf32>
    %82 = arith.select %80, %78, %81 : vector<128x128xi1>, vector<128x128xf32>
    %c127_i32_43 = arith.constant 127 : i32
    %83 = tpu.dynamic_rotate %76 by %c127_i32_43 dim 1 : vector<128x128xf32>, i32 -> vector<128x128xf32>
    %cst_44 = arith.constant 0.000000e+00 : f32
    %84 = vector.shape_cast %6 : vector<1x128xi1> to vector<1x128xi1>
    %85 = vector.broadcast %84 : vector<1x128xi1> to vector<128x128xi1>
    %86 = vector.broadcast %cst_44 : f32 to vector<128x128xf32>
    %87 = arith.select %85, %83, %86 : vector<128x128xi1>, vector<128x128xf32>
    %88 = arith.subf %82, %87 : vector<128x128xf32>
    %c1_i32_45 = arith.constant 1 : i32
    %89 = tpu.dynamic_rotate %77 by %c1_i32_45 dim 1 : vector<128x128xf32>, i32 -> vector<128x128xf32>
    %cst_46 = arith.constant 0.000000e+00 : f32
    %90 = vector.shape_cast %4 : vector<1x128xi1> to vector<1x128xi1>
    %91 = vector.broadcast %90 : vector<1x128xi1> to vector<128x128xi1>
    %92 = vector.broadcast %cst_46 : f32 to vector<128x128xf32>
    %93 = arith.select %91, %89, %92 : vector<128x128xi1>, vector<128x128xf32>
    %cst_47 = arith.constant 2.000000e+00 : f32
    %94 = vector.broadcast %cst_47 : f32 to vector<128x128xf32>
    %95 = arith.mulf %94, %77 : vector<128x128xf32>
    %96 = arith.addf %93, %95 : vector<128x128xf32>
    %c127_i32_48 = arith.constant 127 : i32
    %97 = tpu.dynamic_rotate %77 by %c127_i32_48 dim 1 : vector<128x128xf32>, i32 -> vector<128x128xf32>
    %cst_49 = arith.constant 0.000000e+00 : f32
    %98 = vector.shape_cast %6 : vector<1x128xi1> to vector<1x128xi1>
    %99 = vector.broadcast %98 : vector<1x128xi1> to vector<128x128xi1>
    %100 = vector.broadcast %cst_49 : f32 to vector<128x128xf32>
    %101 = arith.select %99, %97, %100 : vector<128x128xi1>, vector<128x128xf32>
    %102 = arith.addf %96, %101 : vector<128x128xf32>
    %103 = arith.mulf %88, %88 : vector<128x128xf32>
    %104 = arith.mulf %102, %102 : vector<128x128xf32>
    %105 = arith.addf %103, %104 : vector<128x128xf32>
    %cst_50 = arith.constant 9.99999993E-9 : f32
    %106 = vector.broadcast %cst_50 : f32 to vector<128x128xf32>
    %107 = arith.addf %105, %106 : vector<128x128xf32>
    %108 = math.sqrt %107 : vector<128x128xf32>
    %109 = vector.shape_cast %108 : vector<128x128xf32> to vector<1x128x128xf32>
    %cst_51 = arith.constant dense<0xFF800000> : vector<1xf32>
    %110 = vector.multi_reduction <maximumf>, %109, %cst_51 [1, 2] : vector<1x128x128xf32> to vector<1xf32>
    %111 = vector.shape_cast %110 : vector<1xf32> to vector<1x1x1xf32>
    %112 = vector.extract %111[0, 0, 0] : f32 from vector<1x1x1xf32>
    %cst_52 = arith.constant 1.000000e+00 : f32
    %113 = arith.divf %cst_52, %112 : f32
    %114 = vector.broadcast %113 : f32 to vector<128x128xf32>
    %115 = arith.mulf %108, %114 : vector<128x128xf32>
    %c0_53 = arith.constant 0 : index
    %c0_54 = arith.constant 0 : index
    %c0_55 = arith.constant 0 : index
    %116 = vector.load %arg2[%c0_53, %c0_54, %c0_55] : memref<1x128x128xf32, #tpu.memory_space<vmem>>, vector<1x128x128xf32>
    %117 = vector.shape_cast %116 : vector<1x128x128xf32> to vector<128x128xf32>
    %118 = vector.shape_cast %115 : vector<128x128xf32> to vector<1x128x128xf32>
    tpu.vector_store %arg2[%c0_53, %c0_54, %c0_55], %118 {strides = array<i32>} : memref<1x128x128xf32, #tpu.memory_space<vmem>>, vector<1x128x128xf32>,
    return
  }
  func.func @transform_0(%arg0: i32) -> (i32, i32, i32) {
    %c0_i32 = arith.constant 0 : i32
    %c0_i32_0 = arith.constant 0 : i32
    %c0_i32_1 = arith.constant 0 : i32
    return %arg0, %c0_i32, %c0_i32_0 : i32, i32, i32
  }
  func.func @transform_1(%arg0: i32) -> (i32, i32, i32) {
    %c0_i32 = arith.constant 0 : i32
    %c0_i32_0 = arith.constant 0 : i32
    %c0_i32_1 = arith.constant 0 : i32
    return %arg0, %c0_i32, %c0_i32_0 : i32, i32, i32
  }
}

</mosaic_0001>

<bundles_post_ra>
// kernel: tpu_custom_call.1
= control target key start
LH: loop header
LB: loop body
LE: loop exit
PB: predicated region body
PF: predicated region fallthrough
CT: control target
= control target key end

     0   :  { %6 = vsyncpa [#allocation5], 0  ;;  %s2993_s0 = inlined_call_operand.hbm [shape: f32[2,128,128], index: 0, kind: input, shape index: {}]   ;;  %s2994_s1 = inlined_call_operand.hbm [shape: f32[2,128,128], index: 1, kind: output, shape index: {}]  }
   0x1   :  { %8 = vsyncpa [#allocation5 + $0x1], 0 }
   0x2   :  { %9 = vsyncpa [#allocation6], 0 }
   0x3   :  { %11 = vsyncpa [#allocation6 + $0x1], 0  ;;  %s1632_s6 = smov 0   ;;  %s1634_s7 = smov 0  }
   0x4   :  { %s1636_s8 = smov 0   ;;  %s1638_s9 = smov 0  }
   0x5 LB: > { %s1653_s10 = sadd.s32 4294967295, %s1609_s9   ;;  %s1404_s11 = sadd.s32 4294967294, %s1609_s9   ;;  %s1609_s9 = sphi %s1638_s9, %s3013_s9   ;;  %s1605_s8 = sphi %s1636_s8, %s3012_s8   ;;  %s1601_s7 = sphi %s1634_s7, %s3011_s7   ;;  %s1597_s6 = sphi %s1632_s6, %s3010_s6  }
   0x6   : > { %s1657_s12 = sadd.s32 1, %s1609_s9   ;;  %s24_s13 = sadd.s32 1, %s1605_s8 }
   0x7   : > { %s21_s14 = ssub.s32 %s1609_s9, %s1657_s12  ;;  %p31_p0 = scmp.ne.s32.totalorder %s1605_s8, %s1601_s7 }
   0x8   : > { %p22_p1 = scmp.eq.s32.totalorder %s21_s14, 0  ;;  %p32_p2 = scmp.eq.s32.totalorder %s1609_s9, 0 }
   0x9   : > { %p37_p3 = scmp.ne.s32.totalorder %s1601_s7, %s1597_s6  ;;  %p38_p4 = scmp.eq.s32.totalorder %s1653_s10, 0 }
   0xa   : > { %s1669_s15 = scalar_select %p22_p1, %s1605_s8, %s24_s13  }
   0xb   : > { %p1671_p5 = por %p32_p2, %p31_p0  ;;  %p1675_p6 = por %p38_p4, %p37_p3 }
   0xc   : > { %p61_p7 = scmp.eq.s32.totalorder %s1653_s10, 1  ;;  %p67_p8 = scmp.eq.s32.totalorder %s1404_s11, 1 }
   0xd   : > { %p1436_p10 = scmp.lt.s32.totalorder %s1609_s9, 2  ;;  %s87_s20 = sand.u32 1, %s1605_s8  }
   0xe   : > { %p1682_p11 = por %p61_p7, %p31_p0  ;;  %p1686_p12 = por %p67_p8, %p37_p3 }
   0xf   : > { %s1418_s21 = sshll.u32 %s1609_s9, 11  ;;  %s1407_s22 = sshll.u32 %s87_s20, 7 }
  0x10   : > { %s3000_s18 = scalar_select %p1682_p11, 1, 0 }
  0x11   : > { %s3001_s19 = scalar_select %p1686_p12, 1, 0 }
  0x12   : > { %s1695_s25 = scalar_lea.hbm %s2993_s0, %s1418_s21  ;;  %s91_s26 = scalar_lea.vmem [#allocation4], %s1407_s22 }
  0x13   : > { %s98_s27 = sshll.u32 %s91_s26, 4  ;;  %p1699_p13 = pnand %p1436_p10, %p1671_p5  ;;  %s1703_s27 = int_to_ptr.vmem [resolvable:$true] %s98_s27 }
  0x14   : > { %s1705_s29 = scalar_lea.sflag [#allocation5], %s87_s20  ;;  %s1513_s30 = scalar_lea.hbm %s1695_s25, 2048 }
  0x15   : > { %p1514_p0 = scmp.ne.s32.totalorder %s1695_s25, %s1513_s30  ;;  %p1515_p1 = pneg %p1699_p13 }
  0x16   : > { %s1518_s4 = scalar_lea.hbm %s2993_s0, 4096  ;;  %p1519_p4 = scmp.lt.u32.totalorder %s1695_s25, %s2993_s0 }
  0x17   : > { %p1516_p2 = pnand %p1515_p1, %p1514_p0  ;;  %p1520_p5 = scmp.lt.u32.totalorder %s1518_s4, %s1513_s30 }
  0x18   : > { %p1522_p8 = scmp.lt.u32.totalorder %s1513_s30, %s1695_s25 }
  0x19   : > { %p1517_p3 = pneg %p1516_p2  ;;  %p1521_p7 = por %p1520_p5, %p1519_p4 }
  0x1b   : > { %p1523_p10 = por %p1522_p8, %p1521_p7 }
  0x1d   : > { %p1524_p9 = pnand %p1523_p10, %p1517_p3 }
  0x1f   : > { %1527 = shalt.err (!%p1524_p9)
}
  0x20   : > { %s1528_s13 = scalar_lea.vmem %s1703_s27, 2048  ;;  %s1611_s14 = smov [#allocation4]  }
  0x21   : > { %p1529_p0 = scmp.ne.s32.totalorder %s1703_s27, %s1528_s13  ;;  %s1533_s16 = sshll.u32 %s1611_s14, 4  ;;  %s1534_s16 = int_to_ptr.vmem [resolvable:$false] %s1533_s16 }
  0x22   : > { %s1535_s20 = scalar_lea.vmem %s1534_s16, 4096  ;;  %p1536_p11 = scmp.lt.s32.totalorder %s1703_s27, %s1534_s16 }
  0x23   : > { %p1531_p2 = pnand %p1529_p0, %p1515_p1  ;;  %p1537_p4 = scmp.lt.s32.totalorder %s1535_s20, %s1528_s13 }
  0x25   : > { %p1532_p12 = pneg %p1531_p2  ;;  %p1538_p5 = por %p1537_p4, %p1536_p11 }
  0x27   : > { %p1539_p7 = pnand %p1538_p5, %p1532_p12 }
  0x29   : > { %1542 = shalt.err (!%p1539_p7)
}
  0x2a   : > { %s1612_s21 = smov 128   ;;  %s1613_s22 = smov 8  }
  0x2b   : > { %1431 = dma.hbm_to_vmem [thread:$0]  (!%p1699_p13), %s1695_s25, 2048, %s1703_s27, %s1705_s29, %s1612_s21, %s1612_s21, %s1613_s22  }
  0x2c   : > { %p1410_p9 = scmp.ge.s32.totalorder %s1609_s9, 1  ;;  %p106_p1 = scmp.lt.s32.totalorder %s1609_s9, 3 }
  0x2e   : > { %p107_p3 = pnand %p1410_p9, %p106_p1 }
  0x30   : > { %110 = sbr.rel (%p107_p3) target bundleno = 886 (0x376), region = 24 }
  0x37   : > { %s1736_s23 = sand.u32 1, %s1601_s7  }
  0x38   : > { %s1411_s24 = sshll.u32 %s1736_s23, 7  ;;  %s113_s26 = scalar_lea.sflag [#allocation5], %s1736_s23 }
  0x39   : > { %s1742_s30 = scalar_lea.vmem [#allocation4], %s1411_s24 }
  0x3a   : > { %1588 = dma.done.wait (%p1675_p6), %s113_s26, 2048  }
  0x3b   : > { %1590 = vsyncadd (%p1675_p6), %s113_s26, 4294965248  ;;  %v1749_v0 = vld [vmem:[%s1742_s30 + $0x10] sm:$0xff]  ;;  %v1752_v1 = vld [vmem:[%s1742_s30] sm:$0xff]  ;;  %s1614_s25 = smov 2   ;;  %s1615_s17 = smov 1   ;;  %v1617_v16 = vmov 0.0   ;;  %v135_v45 = vlaneseq }
  0x3c   : > { %165 = vrot.lane.b32.xlu1 %v1749_v0, %s1614_s25  ;;  %161 = vrot.lane.b32.xlu0 %v1752_v1, %s1614_s25  ;;  %v1759_v2 = vld [vmem:[%s1742_s30 + $0x18] sm:$0xff]  ;;  %v1762_v3 = vld [vmem:[%s1742_s30 + $0x8] sm:$0xff]  ;;  %s1616_s27 = smov 127   ;;  %141 = vst [vmem:[#allocation2] sm:$0xff] %v1617_v16  ;;  %142 = vst [vmem:[#allocation2 + $0x88] sm:$0xff] %v1617_v16  ;;  %s1618_s28 = smov 126  }
  0x3d   : > { %v1769_v4 = vld [vmem:[%s1742_s30 + $0x28] sm:$0xff]  ;;  %v1772_v5 = vld [vmem:[%s1742_s30 + $0x20] sm:$0xff]  ;;  %v1779_v6 = vld [vmem:[%s1742_s30 + $0x38] sm:$0xff]  ;;  %143 = vst [vmem:[#allocation3] sm:$0xff] %v1617_v16  ;;  %v1930_v48 = vand.u32 127, %v135_v45  ;;  %s1419_s3 = sshll.u32 %s1653_s10, 11 }
  0x3e   : > { %v1782_v7 = vld [vmem:[%s1742_s30 + $0x30] sm:$0xff]  ;;  %v1789_v8 = vld [vmem:[%s1742_s30 + $0x40] sm:$0xff]  ;;  %v1815_v10 = vld [vmem:[%s1742_s30 + $0x48] sm:$0xff]  ;;  %144 = vst [vmem:[#allocation3 + $0x88] sm:$0xff] %v1617_v16  ;;  %s2913_s4 = scalar_lea.vmem [#allocation7], %s1411_s24  ;;  %s2935_s13 = scalar_lea.hbm %s2994_s1, %s1419_s3 }
  0x3f   : > { %v1812_v9 = vld [vmem:[%s1742_s30 + $0x50] sm:$0xff]  ;;  %v1822_v11 = vld [vmem:[%s1742_s30 + $0x60] sm:$0xff]  ;;  %v1825_v12 = vld [vmem:[%s1742_s30 + $0x58] sm:$0xff]  ;;  %vm137_vm0 = vcmp.ge.s32.totalorder %v1930_v48, 2  ;;  %vm138_vm1 = vcmp.ge.s32.totalorder %v1930_v48, 1  ;;  %vm139_vm2 = vcmp.lt.s32.totalorder %v1930_v48, 127 }
  0x40   : > { %167 = vrot.lane.b32.xlu1 %v1759_v2, %s1614_s25  ;;  %163 = vrot.lane.b32.xlu0 %v1762_v3, %s1614_s25  ;;  %v1840_v13 = vld [vmem:[%s1742_s30 + $0x70] sm:$0xff]  ;;  %v1843_v14 = vld [vmem:[%s1742_s30 + $0x68] sm:$0xff]  ;;  %vm140_vm3 = vcmp.lt.s32.totalorder %v1930_v48, 126  ;;  %s1331_s5 = sshll.u32 %s2913_s4, 4  ;;  %s1318_s14 = scalar_lea.sflag [#allocation6], %s1736_s23  ;;  %s2937_s5 = int_to_ptr.vmem [resolvable:$true] %s1331_s5 }
  0x41   : > { %3003 = vst [vmem:[#allocation10_spill] sm:$0xff] %v1840_v13  ;;  %v1850_v15 = vld [vmem:[%s1742_s30 + $0x78] sm:$0xff]  ;;  %s1543_s16 = scalar_lea.vmem %s2937_s5, 2048  ;;  %p3007_p11 = scmp.ne.s32.totalorder %s3000_s18, 0 }
  0x42   : > { %3004 = vst [vmem:[#allocation11_spill] sm:$0xff] %v1850_v15  ;;  %p1544_p6 = scmp.ne.s32.totalorder %s2937_s5, %s1543_s16  ;;  %s1619_s20 = smov [#allocation7]  }
  0x43   : > { %s1547_s21 = sshll.u32 %s1619_s20, 4  ;;  %s1548_s21 = int_to_ptr.vmem [resolvable:$false] %s1547_s21 }
  0x44   : > { %171 = vrot.lane.b32.xlu1 %v1769_v4, %s1614_s25  ;;  %169 = vrot.lane.b32.xlu0 %v1772_v5, %s1614_s25  ;;  %p1545_p12 = pnand %p1544_p6, %p3007_p11  ;;  %s1549_s22 = scalar_lea.vmem %s1548_s21, 4096 }
  0x45   : > { %p1550_p8 = scmp.lt.s32.totalorder %s2937_s5, %s1548_s21  ;;  %p1551_p10 = scmp.lt.s32.totalorder %s1549_s22, %s1543_s16 }
  0x46   : > { %p1546_p13 = pneg %p1545_p12 }
  0x47   : > { %p1552_p0 = por %p1551_p10, %p1550_p8 }
  0x48   : > { %175 = vrot.lane.b32.xlu1 %v1779_v6, %s1614_s25  ;;  %173 = vrot.lane.b32.xlu0 %v1782_v7, %s1614_s25 }
  0x49   : > { %p1553_p2 = pnand %p1552_p0, %p1546_p13 }
  0x4c   : > { %227 = vrot.lane.b32.xlu1 %v1752_v1, %s1615_s17  ;;  %177 = vrot.lane.b32.xlu0 %v1789_v8, %s1614_s25 }
  0x50   : > { %231 = vrot.lane.b32.xlu1 %v1749_v0, %s1615_s17  ;;  %229 = vrot.lane.b32.xlu0 %v1762_v3, %s1615_s17 }
  0x54   : > { %235 = vrot.lane.b32.xlu1 %v1772_v5, %s1615_s17  ;;  %233 = vrot.lane.b32.xlu0 %v1759_v2, %s1615_s17 }
  0x58   : > { %239 = vrot.lane.b32.xlu1 %v1782_v7, %s1615_s17  ;;  %237 = vrot.lane.b32.xlu0 %v1769_v4, %s1615_s17 }
  0x5c   : > { %243 = vrot.lane.b32.xlu1 %v1789_v8, %s1615_s17  ;;  %241 = vrot.lane.b32.xlu0 %v1779_v6, %s1615_s17 }
  0x60   : > { %181 = vrot.lane.b32.xlu1 %v1812_v9, %s1614_s25  ;;  %179 = vrot.lane.b32.xlu0 %v1815_v10, %s1614_s25 }
  0x64   : > { %185 = vrot.lane.b32.xlu1 %v1822_v11, %s1614_s25  ;;  %183 = vrot.lane.b32.xlu0 %v1825_v12, %s1614_s25 }
  0x68   : > { %247 = vrot.lane.b32.xlu1 %v1812_v9, %s1615_s17  ;;  %245 = vrot.lane.b32.xlu0 %v1815_v10, %s1615_s17 }
  0x6c   : > { %251 = vrot.lane.b32.xlu1 %v1822_v11, %s1615_s17  ;;  %249 = vrot.lane.b32.xlu0 %v1825_v12, %s1615_s17 }
  0x70   : > { %189 = vrot.lane.b32.xlu1 %v1840_v13, %s1614_s25  ;;  %187 = vrot.lane.b32.xlu0 %v1843_v14, %s1614_s25 }
  0x74   : > { %253 = vrot.lane.b32.xlu1 %v1843_v14, %s1615_s17  ;;  %191 = vrot.lane.b32.xlu0 %v1850_v15, %s1614_s25 }
  0x78   : > { %257 = vrot.lane.b32.xlu1 %v1850_v15, %s1615_s17  ;;  %255 = vrot.lane.b32.xlu0 %v1840_v13, %s1615_s17 }
  0x7c   : > { %327 = vrot.lane.b32.xlu1 %v1762_v3, %s1616_s27  ;;  %325 = vrot.lane.b32.xlu0 %v1752_v1, %s1616_s27 }
  0x80   : > { %331 = vrot.lane.b32.xlu1 %v1759_v2, %s1616_s27  ;;  %329 = vrot.lane.b32.xlu0 %v1749_v0, %s1616_s27 }
  0x84   : > { %335 = vrot.lane.b32.xlu1 %v1769_v4, %s1616_s27  ;;  %333 = vrot.lane.b32.xlu0 %v1772_v5, %s1616_s27 }
  0x88   : > { %339 = vrot.lane.b32.xlu1 %v1779_v6, %s1616_s27  ;;  %337 = vrot.lane.b32.xlu0 %v1782_v7, %s1616_s27 }
  0x8c   : > { %343 = vrot.lane.b32.xlu1 %v1815_v10, %s1616_s27  ;;  %341 = vrot.lane.b32.xlu0 %v1789_v8, %s1616_s27 }
  0x90   : > { %347 = vrot.lane.b32.xlu1 %v1825_v12, %s1616_s27  ;;  %345 = vrot.lane.b32.xlu0 %v1812_v9, %s1616_s27 }
  0x94   : > { %407 = vrot.lane.b32.xlu1 %v1752_v1, %s1618_s28  ;;  %349 = vrot.lane.b32.xlu0 %v1822_v11, %s1616_s27 }
  0x98   : > { %411 = vrot.lane.b32.xlu1 %v1749_v0, %s1618_s28  ;;  %409 = vrot.lane.b32.xlu0 %v1762_v3, %s1618_s28 }
  0x9c   : > { %415 = vrot.lane.b32.xlu1 %v1772_v5, %s1618_s28  ;;  %413 = vrot.lane.b32.xlu0 %v1759_v2, %s1618_s28 }
  0xa0   : > { %419 = vrot.lane.b32.xlu1 %v1782_v7, %s1618_s28  ;;  %417 = vrot.lane.b32.xlu0 %v1769_v4, %s1618_s28 }
  0xa4   : > { %423 = vrot.lane.b32.xlu1 %v1789_v8, %s1618_s28  ;;  %421 = vrot.lane.b32.xlu0 %v1779_v6, %s1618_s28 }
  0xa8   : > { %353 = vrot.lane.b32.xlu1 %v1840_v13, %s1616_s27  ;;  %351 = vrot.lane.b32.xlu0 %v1843_v14, %s1616_s27 }
  0xac   : > { %425 = vrot.lane.b32.xlu1 %v1815_v10, %s1618_s28  ;;  %355 = vrot.lane.b32.xlu0 %v1850_v15, %s1616_s27 }
  0xae   : > { %v166_v17 = vpop.permute.xlu1 %165  ;;  %v162_v18 = vpop.permute.xlu0 %161 }
  0xaf   : > { %v197_v53 = vsel %vm137_vm0, %v166_v17, 0.0  ;;  %v195_v54 = vsel %vm137_vm0, %v162_v18, 0.0 }
  0xb0   : > { %429 = vrot.lane.b32.xlu1 %v1825_v12, %s1618_s28  ;;  %427 = vrot.lane.b32.xlu0 %v1812_v9, %s1618_s28  ;;  %v213_v57 = vmul.f32 0.13533528, %v197_v53  ;;  %v211_v62 = vmul.f32 0.13533528, %v195_v54 }
  0xb2   : > { %v168_v19 = vpop.permute.xlu1 %167  ;;  %v164_v20 = vpop.permute.xlu0 %163 }
  0xb3   : > { %v198_v55 = vsel %vm137_vm0, %v168_v19, 0.0  ;;  %v196_v63 = vsel %vm137_vm0, %v164_v20, 0.0 }
  0xb4   : > { %433 = vrot.lane.b32.xlu1 %v1843_v14, %s1618_s28  ;;  %431 = vrot.lane.b32.xlu0 %v1822_v11, %s1618_s28  ;;  %v214_v18 = vmul.f32 0.13533528, %v198_v55  ;;  %v212_v20 = vmul.f32 0.13533528, %v196_v63 }
  0xb6   : > { %v172_v21 = vpop.permute.xlu1 %171  ;;  %v170_v22 = vpop.permute.xlu0 %169 }
  0xb7   : > { %v200_v16 = vsel %vm137_vm0, %v172_v21, 0.0  ;;  %v199_v17 = vsel %vm137_vm0, %v170_v22, 0.0 }
  0xb8   : > { %437 = vrot.lane.b32.xlu1 %v1850_v15, %s1618_s28  ;;  %435 = vrot.lane.b32.xlu0 %v1840_v13, %s1618_s28  ;;  %v216_v54 = vmul.f32 0.13533528, %v200_v16  ;;  %v215_v15 = vmul.f32 0.13533528, %v199_v17 }
  0xba   : > { %v176_v23 = vpop.permute.xlu1 %175  ;;  %v174_v24 = vpop.permute.xlu0 %173 }
  0xbe   : > { %v228_v25 = vpop.permute.xlu1 %227  ;;  %v178_v26 = vpop.permute.xlu0 %177 }
  0xbf   : > { %v261_v56 = vsel %vm138_vm1, %v228_v25, 0.0 }
  0xc0   : > { %v277_v19 = vmul.f32 0.60653067, %v261_v56 }
  0xc2   : > { %v232_v27 = vpop.permute.xlu1 %231  ;;  %v230_v28 = vpop.permute.xlu0 %229 }
  0xc3   : > { %v263_v58 = vsel %vm138_vm1, %v232_v27, 0.0  ;;  %v262_v59 = vsel %vm138_vm1, %v230_v28, 0.0  ;;  %v202_v28 = vsel %vm137_vm0, %v176_v23, 0.0  ;;  %v201_v23 = vsel %vm137_vm0, %v174_v24, 0.0 }
  0xc4   : > { %v279_v45 = vmul.f32 0.60653067, %v263_v58  ;;  %v278_v53 = vmul.f32 0.60653067, %v262_v59  ;;  %v218_v56 = vmul.f32 0.13533528, %v202_v28  ;;  %v293_v58 = vadd.f32 %v277_v19, %v211_v62 }
  0xc5   : > { %v203_v59 = vsel %vm137_vm0, %v178_v26, 0.0  ;;  %v217_v26 = vmul.f32 0.13533528, %v201_v23 }
  0xc6   : > { %v236_v29 = vpop.permute.xlu1 %235  ;;  %v234_v30 = vpop.permute.xlu0 %233  ;;  %v295_v63 = vadd.f32 %v279_v45, %v213_v57  ;;  %v294_v16 = vadd.f32 %v278_v53, %v212_v20  ;;  %v219_v57 = vmul.f32 0.13533528, %v203_v59 }
  0xc7   : > { %v265_v25 = vsel %vm138_vm1, %v236_v29, 0.0  ;;  %v264_v27 = vsel %vm138_vm1, %v234_v30, 0.0 }
  0xc8   : > { %v281_v22 = vmul.f32 0.60653067, %v265_v25  ;;  %v280_v55 = vmul.f32 0.60653067, %v264_v27  ;;  %v2001_v20 = vadd.f32 %v294_v16, %v1762_v3 }
  0xca   : > { %v240_v31 = vpop.permute.xlu1 %239  ;;  %v238_v32 = vpop.permute.xlu0 %237  ;;  %v297_v19 = vadd.f32 %v281_v22, %v215_v15  ;;  %v296_v28 = vadd.f32 %v280_v55, %v214_v18  ;;  %v2005_v15 = vadd.f32 %v295_v63, %v1749_v0 }
  0xcb   : > { %v267_v29 = vsel %vm138_vm1, %v240_v31, 0.0  ;;  %v266_v30 = vsel %vm138_vm1, %v238_v32, 0.0 }
  0xcc   : > { %v283_v31 = vmul.f32 0.60653067, %v267_v29  ;;  %v282_v32 = vmul.f32 0.60653067, %v266_v30  ;;  %v309_v29 = vadd.f32 %v293_v58, %v1752_v1 }
  0xce   : > { %v244_v33 = vpop.permute.xlu1 %243  ;;  %v242_v34 = vpop.permute.xlu0 %241  ;;  %v299_v18 = vadd.f32 %v283_v31, %v217_v26  ;;  %v298_v22 = vadd.f32 %v282_v32, %v216_v54  ;;  %v2021_v54 = vadd.f32 %v296_v28, %v1759_v2 }
  0xcf   : > { %v269_v17 = vsel %vm138_vm1, %v244_v33, 0.0  ;;  %v268_v25 = vsel %vm138_vm1, %v242_v34, 0.0 }
  0xd0   : > { %v285_v45 = vmul.f32 0.60653067, %v269_v17  ;;  %v284_v33 = vmul.f32 0.60653067, %v268_v25 }
  0xd2   : > { %v1908_v35 = vpop.permute.xlu1 %181  ;;  %v1910_v36 = vpop.permute.xlu0 %179  ;;  %v301_v23 = vadd.f32 %v285_v45, %v219_v57  ;;  %v300_v58 = vadd.f32 %v284_v33, %v218_v56  ;;  %v2036_v56 = vadd.f32 %v298_v22, %v1769_v4 }
  0xd3   : > { %v204_v34 = vsel %vm137_vm0, %v1910_v36, 0.0  ;;  %v205_v36 = vsel %vm137_vm0, %v1908_v35, 0.0 }
  0xd4   : > { %v220_v3 = vmul.f32 0.13533528, %v204_v34  ;;  %v221_v59 = vmul.f32 0.13533528, %v205_v36  ;;  %v2058_v26 = vadd.f32 %v301_v23, %v1789_v8 }
  0xd6   : > { %v1912_v37 = vpop.permute.xlu1 %185  ;;  %v1914_v38 = vpop.permute.xlu0 %183 }
  0xd7   : > { %v206_v0 = vsel %vm137_vm0, %v1914_v38, 0.0  ;;  %v207_v2 = vsel %vm137_vm0, %v1912_v37, 0.0 }
  0xd8   : > { %v222_v17 = vmul.f32 0.13533528, %v206_v0  ;;  %v223_v57 = vmul.f32 0.13533528, %v207_v2 }
  0xda   : > { %v1916_v39 = vpop.permute.xlu1 %247  ;;  %v246_v40 = vpop.permute.xlu0 %245 }
  0xdb   : > { %v270_v27 = vsel %vm138_vm1, %v246_v40, 0.0  ;;  %v271_v53 = vsel %vm138_vm1, %v1916_v39, 0.0 }
  0xdc   : > { %v286_v40 = vmul.f32 0.60653067, %v270_v27  ;;  %v287_v1 = vmul.f32 0.60653067, %v271_v53  ;;  %v2055_v27 = vadd.f32 %v300_v58, %v1779_v6 }
  0xde   : > { %v1918_v41 = vpop.permute.xlu1 %251  ;;  %v1920_v42 = vpop.permute.xlu0 %249  ;;  %v302_v63 = vadd.f32 %v286_v40, %v220_v3  ;;  %v303_v31 = vadd.f32 %v287_v1, %v221_v59 }
  0xdf   : > { %v272_v39 = vsel %vm138_vm1, %v1920_v42, 0.0  ;;  %v273_v35 = vsel %vm138_vm1, %v1918_v41, 0.0  ;;  %v2027_v42 = vadd.f32 %v297_v19, %v1772_v5  ;;  %v2039_v41 = vadd.f32 %v299_v18, %v1782_v7 }
  0xe0   : > { %v288_v16 = vmul.f32 0.60653067, %v272_v39  ;;  %v289_v32 = vmul.f32 0.60653067, %v273_v35  ;;  %v2064_v28 = vadd.f32 %v302_v63, %v1815_v10 }
  0xe2   : > { %v1922_v43 = vpop.permute.xlu1 %189  ;;  %v1924_v44 = vpop.permute.xlu0 %187  ;;  %v304_v19 = vadd.f32 %v288_v16, %v222_v17  ;;  %v305_v34 = vadd.f32 %v289_v32, %v223_v57 }
  0xe4   : > { %v2086_v3 = vadd.f32 %v304_v19, %v1825_v12  ;;  %v2107_v2 = vadd.f32 %v305_v34, %v1822_v11 }
  0xe6   : > { %v1926_v46 = vpop.permute.xlu1 %253  ;;  %v1928_v47 = vpop.permute.xlu0 %191 }
  0xe7   : > { %v274_v37 = vsel %vm138_vm1, %v1926_v46, 0.0  ;;  %v209_v46 = vsel %vm137_vm0, %v1922_v43, 0.0  ;;  %v210_v6 = vsel %vm137_vm0, %v1928_v47, 0.0 }
  0xe8   : > { %v290_v45 = vmul.f32 0.60653067, %v274_v37  ;;  %v225_v36 = vmul.f32 0.13533528, %v209_v46  ;;  %v226_v47 = vmul.f32 0.13533528, %v210_v6 }
  0xea   : > { %v1932_v49 = vpop.permute.xlu1 %257  ;;  %v1934_v50 = vpop.permute.xlu0 %255 }
  0xee   : > { %v1938_v51 = vpop.permute.xlu1 %327  ;;  %v1940_v52 = vpop.permute.xlu0 %325 }
  0xef   : > { %v359_v38 = vsel %vm139_vm2, %v1940_v52, 0.0  ;;  %v208_v52 = vsel %vm137_vm0, %v1924_v44, 0.0  ;;  %v360_v4 = vsel %vm139_vm2, %v1938_v51, 0.0 }
  0xf0   : > { %v375_v7 = vmul.f32 0.60653067, %v359_v38  ;;  %v224_v51 = vmul.f32 0.13533528, %v208_v52  ;;  %v376_v53 = vmul.f32 0.60653067, %v360_v4 }
  0xf2   : > { %v1954_v60 = vpop.permute.xlu1 %331  ;;  %v1956_v61 = vpop.permute.xlu0 %329  ;;  %v391_v40 = vadd.f32 %v375_v7, %v309_v29  ;;  %v276_v29 = vsel %vm138_vm1, %v1932_v49, 0.0  ;;  %v392_v58 = vadd.f32 %v376_v53, %v2001_v20 }
  0xf3   : > { %v361_v44 = vsel %vm139_vm2, %v1956_v61, 0.0  ;;  %v2075_v61 = vadd.f32 %v303_v31, %v1812_v9  ;;  %v362_v43 = vsel %vm139_vm2, %v1954_v60, 0.0  ;;  %v306_v9 = vadd.f32 %v290_v45, %v224_v51 }
  0xf4   : > { %v377_v18 = vmul.f32 0.60653067, %v361_v44  ;;  %v275_v60 = vsel %vm138_vm1, %v1934_v50, 0.0  ;;  %v378_v35 = vmul.f32 0.60653067, %v362_v43 }
  0xf5   : > { %v292_v16 = vmul.f32 0.60653067, %v276_v29  ;;  %v291_v38 = vmul.f32 0.60653067, %v275_v60 }
  0xf6   : > { %v1970_v21 = vpop.permute.xlu1 %335  ;;  %v1972_v13 = vpop.permute.xlu0 %333  ;;  %v393_v59 = vadd.f32 %v377_v18, %v2005_v15  ;;  %v394_v4 = vadd.f32 %v378_v35, %v2021_v54  ;;  %v3005_v35 = vld [vmem:[#allocation10_spill] sm:$0xff] }
  0xf7   : > { %v363_v39 = vsel %vm139_vm2, %v1972_v13, 0.0  ;;  %v364_v17 = vsel %vm139_vm2, %v1970_v21, 0.0  ;;  %v2125_v21 = vadd.f32 %v306_v9, %v1843_v14  ;;  %v308_v44 = vadd.f32 %v292_v16, %v226_v47 }
  0xf8   : > { %v379_v49 = vmul.f32 0.60653067, %v363_v39  ;;  %v307_v54 = vadd.f32 %v291_v38, %v225_v36  ;;  %v380_v46 = vmul.f32 0.60653067, %v364_v17 }
  0xfa   : > { %v1989_v24 = vpop.permute.xlu1 %339  ;;  %v1991_v62 = vpop.permute.xlu0 %337  ;;  %v395_v7 = vadd.f32 %v379_v49, %v2027_v42  ;;  %v396_v47 = vadd.f32 %v380_v46, %v2036_v56 }
  0xfb   : > { %v365_v20 = vsel %vm139_vm2, %v1991_v62, 0.0  ;;  %v366_v15 = vsel %vm139_vm2, %v1989_v24, 0.0 }
  0xfc   : > { %v381_v24 = vmul.f32 0.60653067, %v365_v20  ;;  %v382_v51 = vmul.f32 0.60653067, %v366_v15 }
  0xfe   : > { %v2013_v55 = vpop.permute.xlu1 %343  ;;  %v2015_v30 = vpop.permute.xlu0 %341  ;;  %v397_v18 = vadd.f32 %v381_v24, %v2039_v41  ;;  %v2157_v41 = vadd.f32 %v307_v54, %v3005_v35  ;;  %v2168_v38 = vadd.f32 %v382_v51, %v2055_v27 }
  0xff   : > { %v368_v45 = vsel %vm139_vm2, %v2013_v55, 0.0  ;;  %v367_v14 = vsel %vm139_vm2, %v2015_v30, 0.0 }
 0x100   : > { %v383_v39 = vmul.f32 0.60653067, %v367_v14 }
 0x102   : > { %v2041_v5 = vpop.permute.xlu1 %347  ;;  %v2043_v25 = vpop.permute.xlu0 %345 }
 0x103   : > { %v370_v53 = vsel %vm139_vm2, %v2041_v5, 0.0 }
 0x104   : > { %v386_v29 = vmul.f32 0.60653067, %v370_v53 }
 0x106   : > { %v408_v8 = vpop.permute.xlu1 %407  ;;  %v2072_v33 = vpop.permute.xlu0 %349  ;;  %v2180_v27 = vadd.f32 %v386_v29, %v2086_v3 }
 0x107   : > { %v441_v10 = vsel %vm140_vm3, %v408_v8, 0.0 }
 0x108   : > { %v457_v22 = vmul.f32 0.13533528, %v441_v10  ;;  %v369_v10 = vsel %vm139_vm2, %v2043_v25, 0.0  ;;  %v384_v25 = vmul.f32 0.60653067, %v368_v45 }
 0x10a   : > { %v2094_v0 = vadd.f32 %v457_v22, %v391_v40  ;;  %v412_v1 = vpop.permute.xlu1 %411  ;;  %v410_v23 = vpop.permute.xlu0 %409 }
 0x10b   : > { %v443_v12 = vsel %vm140_vm3, %v412_v1, 0.0  ;;  %v442_v13 = vsel %vm140_vm3, %v410_v23, 0.0 }
 0x10c   : > { %489 = vst [vmem:[#allocation2 + $0x8] sm:$0xff] %v2094_v0  ;;  %v459_v63 = vmul.f32 0.13533528, %v443_v12  ;;  %v458_v50 = vmul.f32 0.13533528, %v442_v13  ;;  %v371_v13 = vsel %vm139_vm2, %v2072_v33, 0.0  ;;  %v2173_v33 = vadd.f32 %v384_v25, %v2064_v28 }
 0x10d   : > { %v385_v12 = vmul.f32 0.60653067, %v369_v10 }
 0x10e   : > { %v2115_v31 = vadd.f32 %v459_v63, %v393_v59  ;;  %v2117_v32 = vadd.f32 %v458_v50, %v392_v58  ;;  %v416_v52 = vpop.permute.xlu1 %415  ;;  %v414_v37 = vpop.permute.xlu0 %413  ;;  %v3006_v50 = vld [vmem:[#allocation11_spill] sm:$0xff] }
 0x10f   : > { %v445_v11 = vsel %vm140_vm3, %v416_v52, 0.0  ;;  %v444_v62 = vsel %vm140_vm3, %v414_v37, 0.0  ;;  %v2165_v16 = vadd.f32 %v308_v44, %v3006_v50 }
 0x110   : > { %491 = vst [vmem:[#allocation2 + $0x18] sm:$0xff] %v2115_v31  ;;  %490 = vst [vmem:[#allocation2 + $0x10] sm:$0xff] %v2117_v32  ;;  %v461_v57 = vmul.f32 0.13533528, %v445_v11  ;;  %v460_v19 = vmul.f32 0.13533528, %v444_v62 }
 0x112   : > { %v2136_v42 = vadd.f32 %v461_v57, %v395_v7  ;;  %v2138_v6 = vadd.f32 %v460_v19, %v394_v4  ;;  %v420_v8 = vpop.permute.xlu1 %419  ;;  %v418_v34 = vpop.permute.xlu0 %417  ;;  %v2176_v4 = vadd.f32 %v383_v39, %v2058_v26 }
 0x113   : > { %v505_v40 = vld [vmem:[#allocation2 + $0x6] sm:$0xff]  ;;  %v447_v43 = vsel %vm140_vm3, %v420_v8, 0.0  ;;  %v446_v30 = vsel %vm140_vm3, %v418_v34, 0.0  ;;  %v2185_v34 = vadd.f32 %v385_v12, %v2075_v61 }
 0x114   : > { %v537_v55 = vld [vmem:[#allocation2 + $0x7] sm:$0xff]  ;;  %v521_v22 = vmul.f32 0.13533528, %v505_v40  ;;  %493 = vst [vmem:[#allocation2 + $0x28] sm:$0xff] %v2136_v42  ;;  %492 = vst [vmem:[#allocation2 + $0x20] sm:$0xff] %v2138_v6 }
 0x115   : > { %v553_v36 = vmul.f32 0.60653067, %v537_v55  ;;  %v463_v5 = vmul.f32 0.13533528, %v447_v43  ;;  %v462_v9 = vmul.f32 0.13533528, %v446_v30 }
 0x116   : > { %v424_v23 = vpop.permute.xlu1 %423  ;;  %v422_v58 = vpop.permute.xlu0 %421 }
 0x117   : > { %v569_v60 = vadd.f32 %v553_v36, %v521_v22  ;;  %v2154_v1 = vadd.f32 %v463_v5, %v397_v18  ;;  %v506_v59 = vld [vmem:[#allocation2 + $0xe] sm:$0xff]  ;;  %v507_v49 = vld [vmem:[#allocation2 + $0x16] sm:$0xff]  ;;  %v2162_v63 = vadd.f32 %v462_v9, %v396_v47  ;;  %v449_v8 = vsel %vm140_vm3, %v424_v23, 0.0 }
 0x118   : > { %v538_v56 = vld [vmem:[#allocation2 + $0xf] sm:$0xff]  ;;  %v522_v17 = vmul.f32 0.13533528, %v506_v59  ;;  %v523_v15 = vmul.f32 0.13533528, %v507_v49  ;;  %v539_v52 = vld [vmem:[#allocation2 + $0x17] sm:$0xff] }
 0x119   : > { %v601_v20 = vadd.f32 %v569_v60, %v2094_v0  ;;  %v617_v37 = vld [vmem:[#allocation2 + $0x9] sm:$0xff]  ;;  %495 = vst [vmem:[#allocation2 + $0x38] sm:$0xff] %v2154_v1  ;;  %v554_v11 = vmul.f32 0.60653067, %v538_v56  ;;  %v555_v62 = vmul.f32 0.60653067, %v539_v52 }
 0x11a   : > { %v618_v7 = vld [vmem:[#allocation2 + $0x11] sm:$0xff]  ;;  %494 = vst [vmem:[#allocation2 + $0x30] sm:$0xff] %v2162_v63  ;;  %v387_v0 = vmul.f32 0.60653067, %v371_v13  ;;  %v633_v57 = vmul.f32 0.60653067, %v617_v37  ;;  %v354_v44 = vpop.permute.xlu1 %353  ;;  %v352_v54 = vpop.permute.xlu0 %351 }
 0x11b   : > { %v665_v24 = vld [vmem:[#allocation2 + $0xa] sm:$0xff]  ;;  %v634_v19 = vmul.f32 0.60653067, %v618_v7  ;;  %v570_v46 = vadd.f32 %v554_v11, %v522_v17  ;;  %v571_v28 = vadd.f32 %v555_v62, %v523_v15  ;;  %v666_v51 = vld [vmem:[#allocation2 + $0x12] sm:$0xff]  ;;  %v508_v26 = vld [vmem:[#allocation2 + $0x1e] sm:$0xff]  ;;  %v448_v61 = vsel %vm140_vm3, %v422_v58, 0.0 }
 0x11c   : > { %v681_v45 = vmul.f32 0.13533528, %v665_v24  ;;  %v509_v14 = vld [vmem:[#allocation2 + $0x26] sm:$0xff]  ;;  %v649_v53 = vadd.f32 %v633_v57, %v601_v20  ;;  %v524_v3 = vmul.f32 0.13533528, %v508_v26  ;;  %v619_v36 = vld [vmem:[#allocation2 + $0x19] sm:$0xff] }
 0x11d   : > { %v525_v10 = vmul.f32 0.13533528, %v509_v14  ;;  %v540_v40 = vld [vmem:[#allocation2 + $0x1f] sm:$0xff]  ;;  %v541_v55 = vld [vmem:[#allocation2 + $0x27] sm:$0xff]  ;;  %v602_v43 = vadd.f32 %v570_v46, %v2117_v32  ;;  %v603_v30 = vadd.f32 %v571_v28, %v2115_v31  ;;  %v682_v47 = vmul.f32 0.13533528, %v666_v51 }
 0x11e   : > { %v556_v18 = vmul.f32 0.60653067, %v540_v40  ;;  %v557_v22 = vmul.f32 0.60653067, %v541_v55  ;;  %v620_v5 = vld [vmem:[#allocation2 + $0x21] sm:$0xff]  ;;  %v426_v9 = vpop.permute.xlu1 %425  ;;  %v356_v29 = vpop.permute.xlu0 %355  ;;  %v2191_v60 = vadd.f32 %v681_v45, %v649_v53  ;;  %v2194_v31 = vadd.f32 %v387_v0, %v2107_v2 }
 0x11f   : > { %v635_v25 = vmul.f32 0.60653067, %v619_v36  ;;  %v667_v39 = vld [vmem:[#allocation2 + $0x1a] sm:$0xff]  ;;  %v650_v23 = vadd.f32 %v634_v19, %v602_v43  ;;  %v636_v32 = vmul.f32 0.60653067, %v620_v5  ;;  %v668_v13 = vld [vmem:[#allocation2 + $0x22] sm:$0xff] }
 0x120   : > { %v572_v35 = vadd.f32 %v556_v18, %v524_v3  ;;  %v573_v12 = vadd.f32 %v557_v22, %v525_v10  ;;  %v683_v49 = vmul.f32 0.13533528, %v667_v39  ;;  %v373_v58 = vsel %vm139_vm2, %v354_v44, 0.0  ;;  %713 = vst [vmem:[#allocation3 + $0x8] sm:$0xff] %v2191_v60 }
 0x121   : > { %v651_v59 = vadd.f32 %v635_v25, %v603_v30  ;;  %v510_v56 = vld [vmem:[#allocation2 + $0x2e] sm:$0xff]  ;;  %v511_v50 = vld [vmem:[#allocation2 + $0x36] sm:$0xff]  ;;  %v2201_v46 = vadd.f32 %v682_v47, %v650_v23  ;;  %v684_v51 = vmul.f32 0.13533528, %v668_v13  ;;  %v465_v40 = vmul.f32 0.13533528, %v449_v8 }
 0x122   : > { %v542_v20 = vld [vmem:[#allocation2 + $0x2f] sm:$0xff]  ;;  %v604_v17 = vadd.f32 %v572_v35, %v2138_v6  ;;  %v605_v15 = vadd.f32 %v573_v12, %v2136_v42  ;;  %v526_v52 = vmul.f32 0.13533528, %v510_v56  ;;  %v527_v37 = vmul.f32 0.13533528, %v511_v50  ;;  %v543_v11 = vld [vmem:[#allocation2 + $0x37] sm:$0xff]  ;;  %v430_v57 = vpop.permute.xlu1 %429  ;;  %v428_v19 = vpop.permute.xlu0 %427 }
 0x123   : > { %v621_v62 = vld [vmem:[#allocation2 + $0x29] sm:$0xff]  ;;  %v558_v2 = vmul.f32 0.60653067, %v542_v20  ;;  %v559_v7 = vmul.f32 0.60653067, %v543_v11  ;;  %v622_v24 = vld [vmem:[#allocation2 + $0x31] sm:$0xff]  ;;  %v2203_v28 = vadd.f32 %v683_v49, %v651_v59  ;;  %v2215_v47 = vadd.f32 %v465_v40, %v2176_v4 }
 0x124   : > { %v669_v0 = vld [vmem:[#allocation2 + $0x2a] sm:$0xff]  ;;  %v652_v44 = vadd.f32 %v636_v32, %v604_v17  ;;  %v637_v45 = vmul.f32 0.60653067, %v621_v62  ;;  %v670_v6 = vld [vmem:[#allocation2 + $0x32] sm:$0xff]  ;;  %v372_v42 = vsel %vm139_vm2, %v352_v54, 0.0  ;;  %714 = vst [vmem:[#allocation3 + $0x10] sm:$0xff] %v2201_v46 }
 0x125   : > { %v574_v26 = vadd.f32 %v558_v2, %v526_v52  ;;  %v638_v14 = vmul.f32 0.60653067, %v622_v24  ;;  %v685_v53 = vmul.f32 0.13533528, %v669_v0  ;;  %v686_v3 = vmul.f32 0.13533528, %v670_v6 }
 0x126   : > { %715 = vst [vmem:[#allocation3 + $0x18] sm:$0xff] %v2203_v28  ;;  %v2209_v10 = vadd.f32 %v559_v7, %v527_v37  ;;  %v464_v55 = vmul.f32 0.13533528, %v448_v61  ;;  %v389_v43 = vmul.f32 0.60653067, %v373_v58  ;;  %v653_v18 = vadd.f32 %v637_v45, %v605_v15  ;;  %v434_v36 = vpop.permute.xlu1 %433  ;;  %v432_v5 = vpop.permute.xlu0 %431  ;;  %497 = vst [vmem:[#allocation2 + $0x48] sm:$0xff] %v2215_v47 }
 0x127   : > { %v606_v30 = vadd.f32 %v574_v26, %v2162_v63  ;;  %v388_v22 = vmul.f32 0.60653067, %v372_v42  ;;  %v450_v54 = vsel %vm140_vm3, %v426_v9, 0.0  ;;  %v374_v63 = vsel %vm139_vm2, %v356_v29, 0.0  ;;  %v2268_v2 = vld [vmem:[#allocation3 + $0x7] sm:$0xff] }
 0x128   : > { %v2218_v25 = vadd.f32 %v464_v55, %v2168_v38  ;;  %v405_v39 = vadd.f32 %v389_v43, %v2157_v41  ;;  %v466_v8 = vmul.f32 0.13533528, %v450_v54  ;;  %v452_v9 = vsel %vm140_vm3, %v430_v57, 0.0 }
 0x129   : > { %v654_v61 = vadd.f32 %v638_v14, %v606_v30  ;;  %v404_v23 = vadd.f32 %v388_v22, %v2125_v21  ;;  %v390_v38 = vmul.f32 0.60653067, %v374_v63  ;;  %v468_v35 = vmul.f32 0.13533528, %v452_v9 }
 0x12a   : > { %496 = vst [vmem:[#allocation2 + $0x40] sm:$0xff] %v2218_v25  ;;  %v2229_v4 = vadd.f32 %v466_v8, %v2173_v33  ;;  %v451_v41 = vsel %vm140_vm3, %v428_v19, 0.0  ;;  %v454_v21 = vsel %vm140_vm3, %v434_v36, 0.0  ;;  %v453_v29 = vsel %vm140_vm3, %v432_v5, 0.0  ;;  %v438_v32 = vpop.permute.xlu1 %437  ;;  %v436_v13 = vpop.permute.xlu0 %435 }
 0x12b   : > { %v467_v12 = vmul.f32 0.13533528, %v451_v41  ;;  %v2237_v59 = vadd.f32 %v684_v51, %v652_v44  ;;  %v406_v33 = vadd.f32 %v390_v38, %v2165_v16  ;;  %v2242_v49 = vadd.f32 %v468_v35, %v2180_v27  ;;  %v2244_v20 = vld [vmem:[#allocation3 + $0xf] sm:$0xff] }
 0x12c   : > { %498 = vst [vmem:[#allocation2 + $0x50] sm:$0xff] %v2229_v4  ;;  %v470_v56 = vmul.f32 0.13533528, %v454_v21  ;;  %v469_v50 = vmul.f32 0.13533528, %v453_v29  ;;  %v456_v15 = vsel %vm140_vm3, %v438_v32, 0.0  ;;  %v2277_v24 = vadd.f32 %v685_v53, %v653_v18 }
 0x12d   : > { %v2246_v58 = vld [vmem:[#allocation3 + $0x11] sm:$0xff]  ;;  %v2249_v17 = vadd.f32 %v467_v12, %v2185_v34  ;;  %v455_v52 = vsel %vm140_vm3, %v436_v13, 0.0  ;;  %v2259_v27 = vld [vmem:[#allocation3 + $0x9] sm:$0xff]  ;;  %716 = vst [vmem:[#allocation3 + $0x20] sm:$0xff] %v2237_v59  ;;  %500 = vst [vmem:[#allocation2 + $0x60] sm:$0xff] %v2242_v49  ;;  %v2279_v0 = vadd.f32 %v686_v3, %v654_v61  ;;  %v607_v45 = vadd.f32 %v2209_v10, %v2154_v1 }
 0x12e   : > { %v2257_v16 = vsub.f32 %v2244_v20, %v2246_v58  ;;  %v2263_v37 = vadd.f32 %v470_v56, %v404_v23  ;;  %v2266_v34 = vadd.f32 %v469_v50, %v2194_v31  ;;  %v472_v11 = vmul.f32 0.13533528, %v456_v15  ;;  %717 = vst [vmem:[#allocation3 + $0x28] sm:$0xff] %v2277_v24 }
 0x12f   : > { %v471_v62 = vmul.f32 0.13533528, %v455_v52  ;;  %499 = vst [vmem:[#allocation2 + $0x58] sm:$0xff] %v2249_v17  ;;  %v2275_v7 = vsub.f32 %v2268_v2, %v2259_v27  ;;  %718 = vst [vmem:[#allocation3 + $0x30] sm:$0xff] %v2279_v0 }
 0x130   : > { %939 = vrot.lane.b32.xlu1 %v2257_v16, %s1615_s17  ;;  %502 = vst [vmem:[#allocation2 + $0x70] sm:$0xff] %v2263_v37  ;;  %501 = vst [vmem:[#allocation2 + $0x68] sm:$0xff] %v2266_v34  ;;  %v2283_v31 = vadd.f32 %v472_v11, %v406_v33 }
 0x131   : > { %v2285_v57 = vadd.f32 %v471_v62, %v405_v39  ;;  %v512_v19 = vld [vmem:[#allocation2 + $0x3e] sm:$0xff]  ;;  %v513_v44 = vld [vmem:[#allocation2 + $0x46] sm:$0xff]  ;;  %937 = vrot.lane.b32.xlu0 %v2275_v7, %s1615_s17 }
 0x132   : > { %v544_v51 = vld [vmem:[#allocation2 + $0x3f] sm:$0xff]  ;;  %v528_v6 = vmul.f32 0.13533528, %v512_v19  ;;  %v529_v42 = vmul.f32 0.13533528, %v513_v44  ;;  %v545_v26 = vld [vmem:[#allocation2 + $0x47] sm:$0xff] }
 0x133   : > { %v623_v14 = vld [vmem:[#allocation2 + $0x39] sm:$0xff]  ;;  %504 = vst [vmem:[#allocation2 + $0x80] sm:$0xff] %v2283_v31  ;;  %503 = vst [vmem:[#allocation2 + $0x78] sm:$0xff] %v2285_v57  ;;  %v560_v53 = vmul.f32 0.60653067, %v544_v51  ;;  %v624_v40 = vld [vmem:[#allocation2 + $0x41] sm:$0xff] }
 0x134   : > { %v561_v3 = vmul.f32 0.60653067, %v545_v26  ;;  %v639_v55 = vmul.f32 0.60653067, %v623_v14  ;;  %v671_v43 = vld [vmem:[#allocation2 + $0x3a] sm:$0xff]  ;;  %v514_v30 = vld [vmem:[#allocation2 + $0x4e] sm:$0xff] }
 0x135   : > { %v576_v18 = vadd.f32 %v560_v53, %v528_v6  ;;  %v640_v54 = vmul.f32 0.60653067, %v624_v40  ;;  %v672_v36 = vld [vmem:[#allocation2 + $0x42] sm:$0xff]  ;;  %v546_v5 = vld [vmem:[#allocation2 + $0x4f] sm:$0xff]  ;;  %v530_v39 = vmul.f32 0.13533528, %v514_v30 }
 0x136   : > { %v577_v22 = vadd.f32 %v561_v3, %v529_v42  ;;  %v625_v1 = vld [vmem:[#allocation2 + $0x49] sm:$0xff]  ;;  %v655_v10 = vadd.f32 %v639_v55, %v607_v45  ;;  %v562_v8 = vmul.f32 0.60653067, %v546_v5  ;;  %v687_v63 = vmul.f32 0.13533528, %v671_v43  ;;  %v515_v35 = vld [vmem:[#allocation2 + $0x56] sm:$0xff] }
 0x137   : > { %v641_v61 = vmul.f32 0.60653067, %v625_v1  ;;  %v608_v23 = vadd.f32 %v576_v18, %v2218_v25  ;;  %v673_v38 = vld [vmem:[#allocation2 + $0x4a] sm:$0xff]  ;;  %v516_v41 = vld [vmem:[#allocation2 + $0x5e] sm:$0xff]  ;;  %v688_v12 = vmul.f32 0.13533528, %v672_v36 }
 0x138   : > { %v609_v9 = vadd.f32 %v577_v22, %v2215_v47  ;;  %v578_v21 = vadd.f32 %v562_v8, %v530_v39  ;;  %v531_v29 = vmul.f32 0.13533528, %v515_v35  ;;  %v532_v32 = vmul.f32 0.13533528, %v516_v41  ;;  %v547_v50 = vld [vmem:[#allocation2 + $0x57] sm:$0xff]  ;;  %v548_v15 = vld [vmem:[#allocation2 + $0x5f] sm:$0xff] }
 0x139   : > { %v656_v13 = vadd.f32 %v640_v54, %v608_v23  ;;  %v689_v56 = vmul.f32 0.13533528, %v673_v38  ;;  %v626_v52 = vld [vmem:[#allocation2 + $0x51] sm:$0xff]  ;;  %v2297_v11 = vadd.f32 %v687_v63, %v655_v10  ;;  %v563_v62 = vmul.f32 0.60653067, %v547_v50  ;;  %v627_v47 = vld [vmem:[#allocation2 + $0x59] sm:$0xff] }
 0x13a   : > { %v657_v33 = vadd.f32 %v641_v61, %v609_v9  ;;  %v610_v25 = vadd.f32 %v578_v21, %v2229_v4  ;;  %v564_v19 = vmul.f32 0.60653067, %v548_v15  ;;  %v674_v44 = vld [vmem:[#allocation2 + $0x52] sm:$0xff]  ;;  %v642_v51 = vmul.f32 0.60653067, %v626_v52  ;;  %v517_v45 = vld [vmem:[#allocation2 + $0x66] sm:$0xff] }
 0x13b   : > { %719 = vst [vmem:[#allocation3 + $0x38] sm:$0xff] %v2297_v11  ;;  %v2301_v6 = vadd.f32 %v688_v12, %v656_v13  ;;  %v579_v26 = vadd.f32 %v563_v62, %v531_v29  ;;  %v643_v53 = vmul.f32 0.60653067, %v627_v47  ;;  %v690_v3 = vmul.f32 0.13533528, %v674_v44  ;;  %v518_v40 = vld [vmem:[#allocation2 + $0x6e] sm:$0xff] }
 0x13c   : > { %v2303_v42 = vadd.f32 %v689_v56, %v657_v33  ;;  %v580_v14 = vadd.f32 %v564_v19, %v532_v32  ;;  %v549_v55 = vld [vmem:[#allocation2 + $0x67] sm:$0xff]  ;;  %v658_v43 = vadd.f32 %v642_v51, %v610_v25  ;;  %v533_v4 = vmul.f32 0.13533528, %v517_v45  ;;  %v550_v18 = vld [vmem:[#allocation2 + $0x6f] sm:$0xff]  ;;  %v675_v36 = vld [vmem:[#allocation2 + $0x5a] sm:$0xff] }
 0x13d   : > { %v534_v30 = vmul.f32 0.13533528, %v518_v40  ;;  %v628_v22 = vld [vmem:[#allocation2 + $0x61] sm:$0xff]  ;;  %720 = vst [vmem:[#allocation3 + $0x40] sm:$0xff] %v2301_v6  ;;  %v611_v54 = vadd.f32 %v579_v26, %v2249_v17  ;;  %v565_v1 = vmul.f32 0.60653067, %v549_v55 }
 0x13e   : > { %721 = vst [vmem:[#allocation3 + $0x48] sm:$0xff] %v2303_v42  ;;  %v612_v5 = vadd.f32 %v580_v14, %v2242_v49  ;;  %v566_v10 = vmul.f32 0.60653067, %v550_v18  ;;  %v676_v39 = vld [vmem:[#allocation2 + $0x62] sm:$0xff]  ;;  %v644_v8 = vmul.f32 0.60653067, %v628_v22  ;;  %v2309_v61 = vadd.f32 %v690_v3, %v658_v43 }
 0x13f   : > { %v659_v23 = vadd.f32 %v643_v53, %v611_v54  ;;  %v519_v9 = vld [vmem:[#allocation2 + $0x76] sm:$0xff]  ;;  %v520_v38 = vld [vmem:[#allocation2 + $0x7e] sm:$0xff]  ;;  %v691_v35 = vmul.f32 0.13533528, %v675_v36  ;;  %v692_v12 = vmul.f32 0.13533528, %v676_v39  ;;  %v581_v21 = vadd.f32 %v565_v1, %v533_v4 }
 0x140   : > { %v582_v63 = vadd.f32 %v566_v10, %v534_v30  ;;  %v660_v41 = vadd.f32 %v644_v8, %v612_v5  ;;  %722 = vst [vmem:[#allocation3 + $0x50] sm:$0xff] %v2309_v61  ;;  %v535_v29 = vmul.f32 0.13533528, %v519_v9  ;;  %v536_v49 = vmul.f32 0.13533528, %v520_v38  ;;  %v551_v32 = vld [vmem:[#allocation2 + $0x77] sm:$0xff] }
 0x141   : > { %v552_v13 = vld [vmem:[#allocation2 + $0x7f] sm:$0xff]  ;;  %v629_v33 = vld [vmem:[#allocation2 + $0x69] sm:$0xff]  ;;  %v567_v56 = vmul.f32 0.60653067, %v551_v32  ;;  %v630_v15 = vld [vmem:[#allocation2 + $0x71] sm:$0xff]  ;;  %v2313_v52 = vadd.f32 %v691_v35, %v659_v23  ;;  %v613_v3 = vadd.f32 %v581_v21, %v2266_v34 }
 0x142   : > { %v614_v17 = vadd.f32 %v582_v63, %v2263_v37  ;;  %v568_v50 = vmul.f32 0.60653067, %v552_v13  ;;  %v2315_v25 = vadd.f32 %v692_v12, %v660_v41  ;;  %v632_v62 = vld [vmem:[#allocation2 + $0x81] sm:$0xff]  ;;  %v631_v19 = vld [vmem:[#allocation2 + $0x79] sm:$0xff]  ;;  %v646_v47 = vmul.f32 0.60653067, %v630_v15 }
 0x143   : > { %v678_v44 = vld [vmem:[#allocation2 + $0x72] sm:$0xff]  ;;  %v2317_v51 = vld [vmem:[#allocation3 + $0x17] sm:$0xff]  ;;  %v583_v45 = vadd.f32 %v567_v56, %v535_v29  ;;  %v679_v26 = vld [vmem:[#allocation2 + $0x7a] sm:$0xff]  ;;  %723 = vst [vmem:[#allocation3 + $0x58] sm:$0xff] %v2313_v52  ;;  %v647_v36 = vmul.f32 0.60653067, %v631_v19 }
 0x144   : > { %v584_v37 = vadd.f32 %v568_v50, %v536_v49  ;;  %v732_v14 = vld [vmem:[#allocation3 + $0x1f] sm:$0xff]  ;;  %724 = vst [vmem:[#allocation3 + $0x60] sm:$0xff] %v2315_v25  ;;  %v662_v40 = vadd.f32 %v646_v47, %v614_v17  ;;  %v694_v55 = vmul.f32 0.13533528, %v678_v44  ;;  %v734_v30 = vld [vmem:[#allocation3 + $0x2f] sm:$0xff]  ;;  %v733_v8 = vld [vmem:[#allocation3 + $0x27] sm:$0xff] }
 0x145   : > { %v748_v53 = vld [vmem:[#allocation3 + $0x21] sm:$0xff]  ;;  %v747_v4 = vld [vmem:[#allocation3 + $0x19] sm:$0xff]  ;;  %v750_v18 = vld [vmem:[#allocation3 + $0x31] sm:$0xff]  ;;  %v615_v22 = vadd.f32 %v583_v45, %v2285_v57  ;;  %v645_v10 = vmul.f32 0.60653067, %v629_v33  ;;  %v762_v33 = vmul.f32 2.0, %v2201_v46 }
 0x146   : > { %v2322_v43 = vsub.f32 %v732_v14, %v748_v53  ;;  %v616_v54 = vadd.f32 %v584_v37, %v2283_v31  ;;  %v2327_v5 = vsub.f32 %v2317_v51, %v747_v4  ;;  %v749_v1 = vld [vmem:[#allocation3 + $0x29] sm:$0xff]  ;;  %v2329_v39 = vadd.f32 %v694_v55, %v662_v40  ;;  %v677_v23 = vld [vmem:[#allocation2 + $0x6a] sm:$0xff]  ;;  %v680_v41 = vld [vmem:[#allocation2 + $0x82] sm:$0xff] }
 0x147   : > { %v2333_v34 = vsub.f32 %v734_v30, %v750_v18  ;;  %v648_v63 = vmul.f32 0.60653067, %v632_v62  ;;  %v663_v9 = vadd.f32 %v647_v36, %v615_v22  ;;  %v695_v57 = vmul.f32 0.13533528, %v679_v26  ;;  %v752_v38 = vld [vmem:[#allocation3 + $0x41] sm:$0xff]  ;;  %v751_v12 = vld [vmem:[#allocation3 + $0x39] sm:$0xff] }
 0x148   : > { %943 = vrot.lane.b32.xlu1 %v2322_v43, %s1615_s17  ;;  %941 = vrot.lane.b32.xlu0 %v2327_v5, %s1615_s17  ;;  %v2337_v31 = vsub.f32 %v733_v8, %v749_v1  ;;  %v661_v35 = vadd.f32 %v645_v10, %v613_v3  ;;  %726 = vst [vmem:[#allocation3 + $0x70] sm:$0xff] %v2329_v39  ;;  %v736_v29 = vld [vmem:[#allocation3 + $0x3f] sm:$0xff]  ;;  %v693_v49 = vmul.f32 0.13533528, %v677_v23  ;;  %v735_v32 = vld [vmem:[#allocation3 + $0x37] sm:$0xff]  ;;  %v761_v19 = vmul.f32 2.0, %v2191_v60 }
 0x149   : > { %v664_v21 = vadd.f32 %v648_v63, %v616_v54  ;;  %v2340_v17 = vadd.f32 %v695_v57, %v663_v9  ;;  %v2344_v13 = vsub.f32 %v736_v29, %v752_v38  ;;  %v696_v56 = vmul.f32 0.13533528, %v680_v41 }
 0x14a   : > { %v2350_v50 = vsub.f32 %v735_v32, %v751_v12  ;;  %v778_v15 = vadd.f32 %v762_v33, %v2244_v20  ;;  %v2353_v62 = vadd.f32 %v693_v49, %v661_v35  ;;  %v764_v46 = vmul.f32 2.0, %v2237_v59 }
 0x14b   : > { %727 = vst [vmem:[#allocation3 + $0x78] sm:$0xff] %v2340_v17  ;;  %v2356_v47 = vadd.f32 %v696_v56, %v664_v21  ;;  %v777_v44 = vadd.f32 %v761_v19, %v2268_v2  ;;  %v763_v37 = vmul.f32 2.0, %v2203_v28  ;;  %v766_v59 = vmul.f32 2.0, %v2279_v0  ;;  %v755_v10 = vld [vmem:[#allocation3 + $0x59] sm:$0xff] }
 0x14c   : > { %947 = vrot.lane.b32.xlu1 %v2333_v34, %s1615_s17  ;;  %945 = vrot.lane.b32.xlu0 %v2337_v31, %s1615_s17  ;;  %725 = vst [vmem:[#allocation3 + $0x68] sm:$0xff] %v2353_v62  ;;  %v794_v20 = vadd.f32 %v778_v15, %v2246_v58  ;;  %v780_v45 = vadd.f32 %v764_v46, %v732_v14  ;;  %v765_v55 = vmul.f32 2.0, %v2277_v24  ;;  %v768_v28 = vmul.f32 2.0, %v2301_v6  ;;  %v754_v24 = vld [vmem:[#allocation3 + $0x51] sm:$0xff] }
 0x14d   : > { %728 = vst [vmem:[#allocation3 + $0x80] sm:$0xff] %v2356_v47  ;;  %v793_v60 = vadd.f32 %v777_v44, %v2259_v27  ;;  %v779_v26 = vadd.f32 %v763_v37, %v2317_v51  ;;  %v782_v40 = vadd.f32 %v766_v59, %v734_v30  ;;  %v767_v0 = vmul.f32 2.0, %v2297_v11  ;;  %v753_v11 = vld [vmem:[#allocation3 + $0x49] sm:$0xff] }
 0x14e   : > { %v796_v3 = vadd.f32 %v780_v45, %v748_v53  ;;  %v781_v58 = vadd.f32 %v765_v55, %v733_v8  ;;  %v784_v22 = vadd.f32 %v768_v28, %v736_v29  ;;  %v738_v6 = vld [vmem:[#allocation3 + $0x4f] sm:$0xff]  ;;  %v737_v30 = vld [vmem:[#allocation3 + $0x47] sm:$0xff]  ;;  %v740_v8 = vld [vmem:[#allocation3 + $0x5f] sm:$0xff]  ;;  %v770_v9 = vmul.f32 2.0, %v2309_v61 }
 0x14f   : > { %v795_v2 = vadd.f32 %v779_v26, %v747_v4  ;;  %v798_v27 = vadd.f32 %v782_v40, %v750_v18  ;;  %v783_v51 = vadd.f32 %v767_v0, %v735_v32  ;;  %v2390_v18 = vsub.f32 %v738_v6, %v754_v24 }
 0x150   : > { %951 = vrot.lane.b32.xlu1 %v2344_v13, %s1615_s17  ;;  %949 = vrot.lane.b32.xlu0 %v2350_v50, %s1615_s17  ;;  %v797_v14 = vadd.f32 %v781_v58, %v749_v1  ;;  %v800_v53 = vadd.f32 %v784_v22, %v752_v38  ;;  %v2392_v54 = vsub.f32 %v737_v30, %v753_v11  ;;  %v739_v1 = vld [vmem:[#allocation3 + $0x57] sm:$0xff]  ;;  %v769_v57 = vmul.f32 2.0, %v2303_v42 }
 0x151   : > { %v799_v4 = vadd.f32 %v783_v51, %v751_v12  ;;  %v2400_v63 = vsub.f32 %v739_v1, %v755_v10  ;;  %v786_v38 = vadd.f32 %v770_v9, %v738_v6  ;;  %v771_v41 = vmul.f32 2.0, %v2313_v52 }
 0x152   : > { %v785_v35 = vadd.f32 %v769_v57, %v737_v30  ;;  %v772_v21 = vmul.f32 2.0, %v2315_v25  ;;  %v758_v52 = vld [vmem:[#allocation3 + $0x71] sm:$0xff]  ;;  %v773_v59 = vmul.f32 2.0, %v2353_v62  ;;  %v774_v26 = vmul.f32 2.0, %v2329_v39 }
 0x153   : > { %v756_v36 = vld [vmem:[#allocation3 + $0x61] sm:$0xff]  ;;  %v802_v12 = vadd.f32 %v786_v38, %v754_v24  ;;  %v787_v49 = vadd.f32 %v771_v41, %v739_v1  ;;  %v757_v33 = vld [vmem:[#allocation3 + $0x69] sm:$0xff]  ;;  %v775_v55 = vmul.f32 2.0, %v2340_v17  ;;  %v988_v0 = vmul.f32 2.0, %v2322_v43 }
 0x154   : > { %827 = vrot.lane.b32.xlu1 %v794_v20, %s1615_s17  ;;  %825 = vrot.lane.b32.xlu0 %v793_v60, %s1615_s17  ;;  %v2398_v23 = vsub.f32 %v740_v8, %v756_v36  ;;  %v801_v29 = vadd.f32 %v785_v35, %v753_v11  ;;  %v788_v32 = vadd.f32 %v772_v21, %v740_v8  ;;  %v741_v25 = vld [vmem:[#allocation3 + $0x67] sm:$0xff]  ;;  %v742_v56 = vld [vmem:[#allocation3 + $0x6f] sm:$0xff]  ;;  %v744_v46 = vld [vmem:[#allocation3 + $0x7f] sm:$0xff]  ;;  %v991_v38 = vmul.f32 2.0, %v2350_v50 }
 0x155   : > { %v803_v61 = vadd.f32 %v787_v49, %v755_v10  ;;  %v2434_v15 = vsub.f32 %v742_v56, %v758_v52  ;;  %v2436_v19 = vsub.f32 %v741_v25, %v757_v33  ;;  %v760_v44 = vld [vmem:[#allocation3 + $0x81] sm:$0xff]  ;;  %v759_v45 = vld [vmem:[#allocation3 + $0x79] sm:$0xff]  ;;  %v790_v40 = vadd.f32 %v774_v26, %v742_v56 }
 0x156   : > { %v804_v42 = vadd.f32 %v788_v32, %v756_v36  ;;  %v989_v36 = vmul.f32 2.0, %v2337_v31 }
 0x157   : > { %v806_v58 = vadd.f32 %v790_v40, %v758_v52 }
 0x158   : > { %831 = vrot.lane.b32.xlu1 %v796_v3, %s1615_s17  ;;  %829 = vrot.lane.b32.xlu0 %v795_v2, %s1615_s17 }
 0x15c   : > { %835 = vrot.lane.b32.xlu1 %v798_v27, %s1615_s17  ;;  %833 = vrot.lane.b32.xlu0 %v797_v14, %s1615_s17 }
 0x160   : > { %839 = vrot.lane.b32.xlu1 %v800_v53, %s1615_s17  ;;  %837 = vrot.lane.b32.xlu0 %v799_v4, %s1615_s17 }
 0x164   : > { %875 = vrot.lane.b32.xlu1 %v794_v20, %s1616_s27  ;;  %873 = vrot.lane.b32.xlu0 %v793_v60, %s1616_s27  ;;  %v743_v20 = vld [vmem:[#allocation3 + $0x77] sm:$0xff]  ;;  %v2442_v60 = vsub.f32 %v744_v46, %v760_v44 }
 0x165   : > { %v2444_v37 = vsub.f32 %v743_v20, %v759_v45 }
 0x168   : > { %879 = vrot.lane.b32.xlu1 %v796_v3, %s1616_s27  ;;  %877 = vrot.lane.b32.xlu0 %v795_v2, %s1616_s27  ;;  %v789_v3 = vadd.f32 %v773_v59, %v741_v25  ;;  %v776_v2 = vmul.f32 2.0, %v2356_v47 }
 0x16a   : > { %v805_v28 = vadd.f32 %v789_v3, %v757_v33 }
 0x16c   : > { %883 = vrot.lane.b32.xlu1 %v798_v27, %s1616_s27  ;;  %881 = vrot.lane.b32.xlu0 %v797_v14, %s1616_s27  ;;  %v792_v27 = vadd.f32 %v776_v2, %v744_v46  ;;  %v791_v14 = vadd.f32 %v775_v55, %v743_v20 }
 0x16e   : > { %v808_v39 = vadd.f32 %v792_v27, %v760_v44  ;;  %v807_v62 = vadd.f32 %v791_v14, %v759_v45 }
 0x170   : > { %887 = vrot.lane.b32.xlu1 %v800_v53, %s1616_s27  ;;  %885 = vrot.lane.b32.xlu0 %v799_v4, %s1616_s27  ;;  %v987_v53 = vmul.f32 2.0, %v2327_v5 }
 0x174   : > { %955 = vrot.lane.b32.xlu1 %v2390_v18, %s1615_s17  ;;  %953 = vrot.lane.b32.xlu0 %v2392_v54, %s1615_s17 }
 0x178   : > { %959 = vrot.lane.b32.xlu1 %v2398_v23, %s1615_s17  ;;  %957 = vrot.lane.b32.xlu0 %v2400_v63, %s1615_s17 }
 0x17c   : > { %1019 = vrot.lane.b32.xlu1 %v2257_v16, %s1616_s27  ;;  %1017 = vrot.lane.b32.xlu0 %v2275_v7, %s1616_s27 }
 0x180   : > { %1023 = vrot.lane.b32.xlu1 %v2322_v43, %s1616_s27  ;;  %1021 = vrot.lane.b32.xlu0 %v2327_v5, %s1616_s27  ;;  %v990_v43 = vmul.f32 2.0, %v2333_v34 }
 0x184   : > { %1027 = vrot.lane.b32.xlu1 %v2333_v34, %s1616_s27  ;;  %1025 = vrot.lane.b32.xlu0 %v2337_v31, %s1616_s27  ;;  %v992_v34 = vmul.f32 2.0, %v2344_v13 }
 0x188   : > { %1031 = vrot.lane.b32.xlu1 %v2344_v13, %s1616_s27  ;;  %1029 = vrot.lane.b32.xlu0 %v2350_v50, %s1616_s27 }
 0x18c   : > { %843 = vrot.lane.b32.xlu1 %v802_v12, %s1615_s17  ;;  %841 = vrot.lane.b32.xlu0 %v801_v29, %s1615_s17 }
 0x190   : > { %847 = vrot.lane.b32.xlu1 %v804_v42, %s1615_s17  ;;  %845 = vrot.lane.b32.xlu0 %v803_v61, %s1615_s17 }
 0x194   : > { %891 = vrot.lane.b32.xlu1 %v802_v12, %s1616_s27  ;;  %889 = vrot.lane.b32.xlu0 %v801_v29, %s1616_s27 }
 0x198   : > { %895 = vrot.lane.b32.xlu1 %v804_v42, %s1616_s27  ;;  %893 = vrot.lane.b32.xlu0 %v803_v61, %s1616_s27 }
 0x19c   : > { %963 = vrot.lane.b32.xlu1 %v2434_v15, %s1615_s17  ;;  %961 = vrot.lane.b32.xlu0 %v2436_v19, %s1615_s17 }
 0x1a0   : > { %967 = vrot.lane.b32.xlu1 %v2442_v60, %s1615_s17  ;;  %965 = vrot.lane.b32.xlu0 %v2444_v37, %s1615_s17 }
 0x1a2   : > { %v2466_v47 = vpop.permute.xlu1 %939 }
 0x1a3   : > { %v2470_v17 = vpop.permute.xlu0 %937 }
 0x1a4   : > { %1035 = vrot.lane.b32.xlu1 %v2390_v18, %s1616_s27  ;;  %1033 = vrot.lane.b32.xlu0 %v2392_v54, %s1616_s27 }
 0x1a8   : > { %1039 = vrot.lane.b32.xlu1 %v2398_v23, %s1616_s27  ;;  %1037 = vrot.lane.b32.xlu0 %v2400_v63, %s1616_s27 }
 0x1ac   : > { %851 = vrot.lane.b32.xlu1 %v806_v58, %s1615_s17  ;;  %849 = vrot.lane.b32.xlu0 %v805_v28, %s1615_s17 }
 0x1b0   : > { %855 = vrot.lane.b32.xlu1 %v808_v39, %s1615_s17  ;;  %853 = vrot.lane.b32.xlu0 %v807_v62, %s1615_s17 }
 0x1b4   : > { %899 = vrot.lane.b32.xlu1 %v806_v58, %s1616_s27  ;;  %897 = vrot.lane.b32.xlu0 %v805_v28, %s1616_s27 }
 0x1b8   : > { %903 = vrot.lane.b32.xlu1 %v808_v39, %s1616_s27  ;;  %901 = vrot.lane.b32.xlu0 %v807_v62, %s1616_s27 }
 0x1ba   : > { %v944_v22 = vpop.permute.xlu1 %943  ;;  %v942_v4 = vpop.permute.xlu0 %941 }
 0x1bb   : > { %v972_v51 = vsel %vm138_vm1, %v944_v22, 0.0  ;;  %v971_v11 = vsel %vm138_vm1, %v942_v4, 0.0 }
 0x1bc   : > { %v2478_v24 = vadd.f32 %v988_v0, %v972_v51  ;;  %1043 = vrot.lane.b32.xlu1 %v2434_v15, %s1616_s27  ;;  %v2484_v6 = vadd.f32 %v987_v53, %v971_v11  ;;  %1041 = vrot.lane.b32.xlu0 %v2436_v19, %s1616_s27 }
 0x1be   : > { %v948_v30 = vpop.permute.xlu1 %947  ;;  %v946_v1 = vpop.permute.xlu0 %945 }
 0x1bf   : > { %v974_v5 = vsel %vm138_vm1, %v948_v30, 0.0  ;;  %v973_v8 = vsel %vm138_vm1, %v946_v1, 0.0 }
 0x1c0   : > { %v2492_v10 = vadd.f32 %v990_v43, %v974_v5  ;;  %1047 = vrot.lane.b32.xlu1 %v2442_v60, %s1616_s27  ;;  %v2498_v9 = vadd.f32 %v989_v36, %v973_v8  ;;  %1045 = vrot.lane.b32.xlu0 %v2444_v37, %s1616_s27 }
 0x1c2   : > { %v952_v57 = vpop.permute.xlu1 %951  ;;  %v950_v31 = vpop.permute.xlu0 %949 }
 0x1c3   : > { %v976_v35 = vsel %vm138_vm1, %v952_v57, 0.0  ;;  %v975_v41 = vsel %vm138_vm1, %v950_v31, 0.0 }
 0x1c4   : > { %v2508_v12 = vadd.f32 %v992_v34, %v976_v35  ;;  %v2510_v21 = vadd.f32 %v991_v38, %v975_v41  ;;  %v970_v35 = vsel %vm138_vm1, %v2466_v47, 0.0 }
 0x1c6   : > { %v828_v29 = vpop.permute.xlu1 %827  ;;  %v826_v49 = vpop.permute.xlu0 %825 }
 0x1c7   : > { %v858_v33 = vsel %vm138_vm1, %v828_v29, 0.0  ;;  %v857_v44 = vsel %vm138_vm1, %v826_v49, 0.0  ;;  %v986_v29 = vmul.f32 2.0, %v2257_v16  ;;  %v969_v49 = vsel %vm138_vm1, %v2470_v17, 0.0 }
 0x1ca   : > { %v832_v32 = vpop.permute.xlu1 %831  ;;  %v830_v42 = vpop.permute.xlu0 %829 }
 0x1cb   : > { %v860_v3 = vsel %vm138_vm1, %v832_v32, 0.0  ;;  %v859_v55 = vsel %vm138_vm1, %v830_v42, 0.0  ;;  %v985_v32 = vmul.f32 2.0, %v2275_v7  ;;  %v1002_v42 = vadd.f32 %v986_v29, %v970_v35 }
 0x1ce   : > { %v836_v61 = vpop.permute.xlu1 %835  ;;  %v834_v13 = vpop.permute.xlu0 %833 }
 0x1cf   : > { %v862_v39 = vsel %vm138_vm1, %v836_v61, 0.0  ;;  %v861_v22 = vsel %vm138_vm1, %v834_v13, 0.0  ;;  %v1001_v13 = vadd.f32 %v985_v32, %v969_v49 }
 0x1d2   : > { %v840_v52 = vpop.permute.xlu1 %839  ;;  %v838_v25 = vpop.permute.xlu0 %837 }
 0x1d3   : > { %v864_v43 = vsel %vm138_vm1, %v840_v52, 0.0  ;;  %v863_v36 = vsel %vm138_vm1, %v838_v25, 0.0 }
 0x1d6   : > { %v876_v50 = vpop.permute.xlu1 %875  ;;  %v874_v56 = vpop.permute.xlu0 %873 }
 0x1d7   : > { %v906_v46 = vsel %vm139_vm2, %v876_v50, 0.0  ;;  %v905_v20 = vsel %vm139_vm2, %v874_v56, 0.0 }
 0x1d8   : > { %v922_v45 = vsub.f32 %v858_v33, %v906_v46  ;;  %v921_v59 = vsub.f32 %v857_v44, %v905_v20 }
 0x1da   : > { %v880_v26 = vpop.permute.xlu1 %879  ;;  %v878_v40 = vpop.permute.xlu0 %877  ;;  %v1082_v56 = vmul.f32 %v922_v45, %v922_v45  ;;  %v1081_v44 = vmul.f32 %v921_v59, %v921_v59 }
 0x1db   : > { %v908_v2 = vsel %vm139_vm2, %v880_v26, 0.0  ;;  %v907_v58 = vsel %vm139_vm2, %v878_v40, 0.0 }
 0x1dc   : > { %v924_v27 = vsub.f32 %v860_v3, %v908_v2  ;;  %v923_v28 = vsub.f32 %v859_v55, %v907_v58 }
 0x1de   : > { %v884_v14 = vpop.permute.xlu1 %883  ;;  %v882_v62 = vpop.permute.xlu0 %881  ;;  %v1084_v58 = vmul.f32 %v924_v27, %v924_v27 }
 0x1df   : > { %v910_v0 = vsel %vm139_vm2, %v884_v14, 0.0  ;;  %v909_v51 = vsel %vm139_vm2, %v882_v62, 0.0 }
 0x1e0   : > { %v926_v53 = vsub.f32 %v862_v39, %v910_v0  ;;  %v925_v4 = vsub.f32 %v861_v22, %v909_v51  ;;  %v1083_v39 = vmul.f32 %v923_v28, %v923_v28 }
 0x1e2   : > { %v888_v11 = vpop.permute.xlu1 %887  ;;  %v886_v30 = vpop.permute.xlu0 %885 }
 0x1e3   : > { %v912_v5 = vsel %vm139_vm2, %v888_v11, 0.0  ;;  %v911_v1 = vsel %vm139_vm2, %v886_v30, 0.0  ;;  %v1086_v30 = vmul.f32 %v926_v53, %v926_v53 }
 0x1e4   : > { %v928_v8 = vsub.f32 %v864_v43, %v912_v5  ;;  %v927_v34 = vsub.f32 %v863_v36, %v911_v1  ;;  %v1085_v5 = vmul.f32 %v925_v4, %v925_v4 }
 0x1e6   : > { %v2544_v57 = vpop.permute.xlu1 %955  ;;  %v2546_v38 = vpop.permute.xlu0 %953 }
 0x1ea   : > { %v2548_v31 = vpop.permute.xlu1 %959  ;;  %v2553_v41 = vpop.permute.xlu0 %957 }
 0x1ee   : > { %v1020_v61 = vpop.permute.xlu1 %1019  ;;  %v1018_v52 = vpop.permute.xlu0 %1017 }
 0x1ef   : > { %v1050_v25 = vsel %vm139_vm2, %v1020_v61, 0.0  ;;  %v1049_v47 = vsel %vm139_vm2, %v1018_v52, 0.0  ;;  %v1087_v61 = vmul.f32 %v927_v34, %v927_v34 }
 0x1f0   : > { %v1066_v50 = vadd.f32 %v1050_v25, %v1002_v42  ;;  %v1065_v33 = vadd.f32 %v1049_v47, %v1001_v13 }
 0x1f2   : > { %v1098_v16 = vmul.f32 %v1066_v50, %v1066_v50  ;;  %v1024_v46 = vpop.permute.xlu1 %1023  ;;  %v1097_v20 = vmul.f32 %v1065_v33, %v1065_v33  ;;  %v1022_v17 = vpop.permute.xlu0 %1021 }
 0x1f3   : > { %v1052_v7 = vsel %vm139_vm2, %v1024_v46, 0.0  ;;  %v1051_v3 = vsel %vm139_vm2, %v1022_v17, 0.0  ;;  %v993_v17 = vmul.f32 2.0, %v2392_v54  ;;  %v995_v54 = vmul.f32 2.0, %v2400_v63 }
 0x1f4   : > { %v1114_v26 = vadd.f32 %v1098_v16, %v1082_v56  ;;  %v1068_v40 = vadd.f32 %v1052_v7, %v2478_v24  ;;  %v1113_v2 = vadd.f32 %v1097_v20, %v1081_v44  ;;  %v1067_v55 = vadd.f32 %v1051_v3, %v2484_v6 }
 0x1f5   : > { %v977_v3 = vsel %vm138_vm1, %v2546_v38, 0.0 }
 0x1f6   : > { %v1100_v14 = vmul.f32 %v1068_v40, %v1068_v40  ;;  %v1028_v45 = vpop.permute.xlu1 %1027  ;;  %v1099_v62 = vmul.f32 %v1067_v55, %v1067_v55  ;;  %v1026_v59 = vpop.permute.xlu0 %1025  ;;  %v978_v40 = vsel %vm138_vm1, %v2544_v57, 0.0  ;;  %v2624_v57 = vmul.f32 2.0, %v2434_v15 }
 0x1f7   : > { %v1054_v0 = vsel %vm139_vm2, %v1028_v45, 0.0  ;;  %v1053_v51 = vsel %vm139_vm2, %v1026_v59, 0.0  ;;  %v2627_v45 = vmul.f32 2.0, %v2444_v37 }
 0x1f8   : > { %v1116_v22 = vadd.f32 %v1100_v14, %v1084_v58  ;;  %v1070_v11 = vadd.f32 %v1054_v0, %v2492_v10  ;;  %v1115_v43 = vadd.f32 %v1099_v62, %v1083_v39  ;;  %v1069_v24 = vadd.f32 %v1053_v51, %v2498_v9 }
 0x1f9   : > { %v1088_v9 = vmul.f32 %v928_v8, %v928_v8  ;;  %v2594_v8 = vadd.f32 1e-08, %v1113_v2  ;;  %v980_v2 = vsel %vm138_vm1, %v2548_v31, 0.0  ;;  %v979_v58 = vsel %vm138_vm1, %v2553_v41, 0.0 }
 0x1fa   : > { %v1102_v6 = vmul.f32 %v1070_v11, %v1070_v11  ;;  %v1032_v27 = vpop.permute.xlu1 %1031  ;;  %v1101_v36 = vmul.f32 %v1069_v24, %v1069_v24  ;;  %v1030_v28 = vpop.permute.xlu0 %1029  ;;  %v996_v14 = vmul.f32 2.0, %v2398_v23  ;;  %v2618_v38 = vadd.f32 1e-08, %v1116_v22 }
 0x1fb   : > { %v1056_v1 = vsel %vm139_vm2, %v1032_v27, 0.0  ;;  %v1055_v29 = vsel %vm139_vm2, %v1030_v28, 0.0  ;;  %v1009_v31 = vadd.f32 %v993_v17, %v977_v3  ;;  %v1011_v59 = vadd.f32 %v995_v54, %v979_v58 }
 0x1fc   : > { %v2578_v35 = vadd.f32 %v1102_v6, %v1086_v30  ;;  %v1072_v49 = vadd.f32 %v1056_v1, %v2508_v12  ;;  %v1117_v10 = vadd.f32 %v1101_v36, %v1085_v5  ;;  %v1071_v32 = vadd.f32 %v1055_v29, %v2510_v21 }
 0x1fd   : > { %v2592_v21 = vadd.f32 1e-08, %v1114_v26  ;;  %v994_v26 = vmul.f32 2.0, %v2390_v18  ;;  %v2621_v18 = vmul.f32 2.0, %v2436_v19  ;;  %v1012_v62 = vadd.f32 %v996_v14, %v980_v2 }
 0x1fe   : > { %v1104_v53 = vmul.f32 %v1072_v49, %v1072_v49  ;;  %v844_v42 = vpop.permute.xlu1 %843  ;;  %v1103_v4 = vmul.f32 %v1071_v32, %v1071_v32  ;;  %v842_v13 = vpop.permute.xlu0 %841  ;;  %v2633_v0 = vadd.f32 1e-08, %v1115_v43  ;;  %v2644_v24 = vadd.f32 1e-08, %v1117_v10 }
 0x1ff   : > { %1479 = vrsqrt.f32 %v2592_v21  ;;  %v1010_v39 = vadd.f32 %v994_v26, %v978_v40  ;;  %v866_v43 = vsel %vm138_vm1, %v844_v42, 0.0  ;;  %v865_v27 = vsel %vm138_vm1, %v842_v13, 0.0 }
 0x200   : > { %v2584_v52 = vadd.f32 %v1104_v53, %v1088_v9  ;;  %v2586_v25 = vadd.f32 %v1103_v4, %v1087_v61  ;;  %1481 = vrsqrt.f32 %v2594_v8  ;;  %v2664_v4 = vmul.f32 2.0, %v2442_v60 }
 0x201   : > { %1483 = vrsqrt.f32 %v2618_v38  ;;  %vm1147_vm4 = vcmp.eq.f32.partialorder %v2594_v8, inf  ;;  %vm1149_vm5 = vcmp.eq.f32.partialorder %v2594_v8, 0.0  ;;  %vm1154_vm6 = vcmp.eq.f32.partialorder %v2592_v21, inf }
 0x202   : > { %v848_v47 = vpop.permute.xlu1 %847  ;;  %v846_v50 = vpop.permute.xlu0 %845  ;;  %1485 = vrsqrt.f32 %v2633_v0  ;;  %v2679_v40 = vadd.f32 1e-08, %v2584_v52  ;;  %v2683_v54 = vadd.f32 1e-08, %v2586_v25  ;;  %vm1156_vm7 = vcmp.eq.f32.partialorder %v2592_v21, 0.0 }
 0x203   : > { %v868_v49 = vsel %vm138_vm1, %v848_v47, 0.0  ;;  %v867_v42 = vsel %vm138_vm1, %v846_v50, 0.0  ;;  %1487 = vrsqrt.f32 %v2644_v24  ;;  %v2670_v47 = vadd.f32 1e-08, %v2578_v35 }
 0x204   : > { %v1150_v35 = vand.u32 2147483648, %v2594_v8  ;;  %v1157_v52 = vand.u32 2147483648, %v2592_v21  ;;  %vm1168_vm8 = vcmp.eq.f32.partialorder %v2618_v38, inf  ;;  %vm1175_vm9 = vcmp.eq.f32.partialorder %v2644_v24, inf }
 0x205   : > { %1489 = vrsqrt.f32 %v2670_v47  ;;  %vm1161_vm10 = vcmp.eq.f32.partialorder %v2633_v0, inf  ;;  %vm1170_vm11 = vcmp.eq.f32.partialorder %v2618_v38, 0.0  ;;  %vm1177_vm12 = vcmp.eq.f32.partialorder %v2644_v24, 0.0 }
 0x206   : > { %v892_v33 = vpop.permute.xlu1 %891  ;;  %v890_v56 = vpop.permute.xlu0 %889  ;;  %1491 = vrsqrt.f32 %v2679_v40  ;;  %vm1182_vm13 = vcmp.eq.f32.partialorder %v2670_v47, inf  ;;  %vm1189_vm14 = vcmp.eq.f32.partialorder %v2683_v54, inf  ;;  %vm1196_vm15 = vcmp.eq.f32.partialorder %v2679_v40, inf }
 0x207   : > { %v914_v15 = vsel %vm139_vm2, %v892_v33, 0.0  ;;  %v913_v22 = vsel %vm139_vm2, %v890_v56, 0.0  ;;  %1493 = vrsqrt.f32 %v2683_v54  ;;  %vm1163_vm0 = vcmp.eq.f32.partialorder %v2633_v0, 0.0 }
 0x208   : > { %v930_v5 = vsub.f32 %v866_v43, %v914_v15  ;;  %v929_v10 = vsub.f32 %v865_v27, %v913_v22  ;;  %v1185_v43 = vand.u32 2147483648, %v2670_v47  ;;  %vm1191_vm3 = vcmp.eq.f32.partialorder %v2683_v54, 0.0 }
 0x209   : > { %v1480_v29 = vpop.eup %1479 }
 0x20a   : > { %v896_v16 = vpop.permute.xlu1 %895  ;;  %v894_v46 = vpop.permute.xlu0 %893  ;;  %v1089_v50 = vmul.f32 %v929_v10, %v929_v10  ;;  %v1153_v26 = vmul.f32 %v1480_v29, %v2592_v21 }
 0x20b   : > { %v916_v30 = vsel %vm139_vm2, %v896_v16, 0.0  ;;  %v915_v36 = vsel %vm139_vm2, %v894_v46, 0.0  ;;  %v1482_v53 = vpop.eup %1481  ;;  %v1090_v16 = vmul.f32 %v930_v5, %v930_v5 }
 0x20c   : > { %v932_v61 = vsub.f32 %v868_v49, %v916_v30  ;;  %v931_v33 = vsub.f32 %v867_v42, %v915_v36  ;;  %v1146_v3 = vmul.f32 %v1482_v53, %v2594_v8 }
 0x20e   : > { %v2588_v12 = vpop.permute.xlu1 %963  ;;  %v2590_v44 = vpop.permute.xlu0 %961  ;;  %v1092_v2 = vmul.f32 %v932_v61, %v932_v61  ;;  %v1091_v58 = vmul.f32 %v931_v33, %v931_v33  ;;  %v1148_v25 = vsel %vm1147_vm4, %v2594_v8, %v1146_v3 }
 0x20f   : > { %v981_v30 = vsel %vm138_vm1, %v2590_v44, 0.0  ;;  %v2713_v5 = vsel %vm1149_vm5, %v1150_v35, %v1148_v25  ;;  %v1192_v44 = vand.u32 2147483648, %v2683_v54 }
 0x210   : > { %v1013_v53 = vadd.f32 %v2621_v18, %v981_v30 }
 0x212   : > { %v2596_v34 = vpop.permute.xlu1 %967  ;;  %v2598_v20 = vpop.permute.xlu0 %965 }
 0x213   : > { %v984_v42 = vsel %vm138_vm1, %v2596_v34, 0.0  ;;  %v983_v61 = vsel %vm138_vm1, %v2598_v20, 0.0 }
 0x214   : > { %v1015_v3 = vadd.f32 %v2627_v45, %v983_v61 }
 0x216   : > { %v1036_v7 = vpop.permute.xlu1 %1035  ;;  %v1034_v55 = vpop.permute.xlu0 %1033 }
 0x217   : > { %v1058_v63 = vsel %vm139_vm2, %v1036_v7, 0.0  ;;  %v1057_v23 = vsel %vm139_vm2, %v1034_v55, 0.0 }
 0x218   : > { %v1074_v51 = vadd.f32 %v1058_v63, %v1010_v39  ;;  %v1073_v6 = vadd.f32 %v1057_v23, %v1009_v31  ;;  %v1484_v63 = vpop.eup %1483 }
 0x219   : > { %v1486_v22 = vpop.eup %1485  ;;  %v1167_v49 = vmul.f32 %v1484_v63, %v2618_v38 }
 0x21a   : > { %v1040_v41 = vpop.permute.xlu1 %1039  ;;  %v1038_v19 = vpop.permute.xlu0 %1037  ;;  %v1106_v13 = vmul.f32 %v1074_v51, %v1074_v51  ;;  %v1105_v56 = vmul.f32 %v1073_v6, %v1073_v6  ;;  %v982_v51 = vsel %vm138_vm1, %v2588_v12, 0.0 }
 0x21b   : > { %v1060_v37 = vsel %vm139_vm2, %v1040_v41, 0.0  ;;  %v1059_v11 = vsel %vm139_vm2, %v1038_v19, 0.0  ;;  %v1155_v41 = vsel %vm1154_vm6, %v2592_v21, %v1153_v26  ;;  %v1171_v19 = vand.u32 2147483648, %v2618_v38  ;;  %v1488_v10 = vpop.eup %1487 }
 0x21c   : > { %v1076_v28 = vadd.f32 %v1060_v37, %v1012_v62  ;;  %v1075_v32 = vadd.f32 %v1059_v11, %v1011_v59  ;;  %v1122_v55 = vadd.f32 %v1106_v13, %v1090_v16  ;;  %v1121_v14 = vadd.f32 %v1105_v56, %v1089_v50 }
 0x21d   : > { %v1164_v59 = vand.u32 2147483648, %v2633_v0  ;;  %v1178_v37 = vand.u32 2147483648, %v2644_v24  ;;  %v2717_v36 = vsel %vm1156_vm7, %v1157_v52, %v1155_v41  ;;  %v1014_v8 = vadd.f32 %v2624_v57, %v982_v51 }
 0x21e   : > { %v2654_v1 = vpop.permute.xlu1 %851  ;;  %v2659_v9 = vpop.permute.xlu0 %849  ;;  %v1108_v46 = vmul.f32 %v1076_v28, %v1076_v28  ;;  %v1107_v7 = vmul.f32 %v1075_v32, %v1075_v32  ;;  %v2695_v15 = vadd.f32 1e-08, %v1122_v55  ;;  %v2703_v11 = vadd.f32 1e-08, %v1121_v14 }
 0x21f   : > { %v2731_v32 = vmul.f32 %v1486_v22, %v2633_v0  ;;  %v870_v57 = vsel %vm138_vm1, %v2654_v1, 0.0  ;;  %v869_v18 = vsel %vm138_vm1, %v2659_v9, 0.0  ;;  %v1016_v26 = vadd.f32 %v2664_v4, %v984_v42 }
 0x220   : > { %v1124_v31 = vadd.f32 %v1108_v46, %v1092_v2  ;;  %v1123_v62 = vadd.f32 %v1107_v7, %v1091_v58  ;;  %1495 = vrsqrt.f32 %v2695_v15  ;;  %v1490_v46 = vpop.eup %1489  ;;  %v1174_v7 = vmul.f32 %v1488_v10, %v2644_v24 }
 0x221   : > { %1497 = vrsqrt.f32 %v2703_v11  ;;  %v1492_v35 = vpop.eup %1491  ;;  %v1169_v22 = vsel %vm1168_vm8, %v2618_v38, %v1167_v49  ;;  %vm1203_vm4 = vcmp.eq.f32.partialorder %v2703_v11, inf  ;;  %vm1210_vm5 = vcmp.eq.f32.partialorder %v2695_v15, inf }
 0x222   : > { %v2672_v17 = vpop.permute.xlu1 %855  ;;  %v2674_v60 = vpop.permute.xlu0 %853  ;;  %v2709_v6 = vadd.f32 1e-08, %v1124_v31  ;;  %v2719_v12 = vadd.f32 1e-08, %v1123_v62  ;;  %vm1205_vm8 = vcmp.eq.f32.partialorder %v2703_v11, 0.0 }
 0x223   : > { %v872_v2 = vsel %vm138_vm1, %v2672_v17, 0.0  ;;  %v871_v58 = vsel %vm138_vm1, %v2674_v60, 0.0  ;;  %v1494_v4 = vpop.eup %1493  ;;  %vm1184_vm1 = vcmp.eq.f32.partialorder %v2670_v47, 0.0 }
 0x224   : > { %1499 = vrsqrt.f32 %v2709_v6  ;;  %v1188_v61 = vmul.f32 %v1494_v4, %v2683_v54  ;;  %vm1217_vm6 = vcmp.eq.f32.partialorder %v2719_v12, inf  ;;  %vm1224_vm7 = vcmp.eq.f32.partialorder %v2709_v6, inf }
 0x225   : > { %1501 = vrsqrt.f32 %v2719_v12 }
 0x226   : > { %v900_v39 = vpop.permute.xlu1 %899  ;;  %v898_v23 = vpop.permute.xlu0 %897  ;;  %v1190_v38 = vsel %vm1189_vm14, %v2683_v54, %v1188_v61  ;;  %v1213_v54 = vand.u32 2147483648, %v2695_v15 }
 0x227   : > { %v918_v28 = vsel %vm139_vm2, %v900_v39, 0.0  ;;  %v917_v21 = vsel %vm139_vm2, %v898_v23, 0.0 }
 0x228   : > { %v934_v13 = vsub.f32 %v870_v57, %v918_v28  ;;  %v933_v34 = vsub.f32 %v869_v18, %v917_v21  ;;  %v1181_v28 = vmul.f32 %v1490_v46, %v2670_v47  ;;  %v1195_v21 = vmul.f32 %v1492_v35, %v2679_v40 }
 0x22a   : > { %v904_v27 = vpop.permute.xlu1 %903  ;;  %v902_v29 = vpop.permute.xlu0 %901  ;;  %v1094_v14 = vmul.f32 %v934_v13, %v934_v13  ;;  %v1093_v17 = vmul.f32 %v933_v34, %v933_v34 }
 0x22b   : > { %v920_v56 = vsel %vm139_vm2, %v904_v27, 0.0  ;;  %v919_v20 = vsel %vm139_vm2, %v902_v29, 0.0  ;;  %v1176_v27 = vsel %vm1175_vm9, %v2644_v24, %v1174_v7  ;;  %v1496_v29 = vpop.eup %1495  ;;  %vm1212_vm9 = vcmp.eq.f32.partialorder %v2695_v15, 0.0 }
 0x22c   : > { %v936_v63 = vsub.f32 %v872_v2, %v920_v56  ;;  %v935_v39 = vsub.f32 %v871_v58, %v919_v20  ;;  %v1498_v49 = vpop.eup %1497  ;;  %v2813_v20 = vsel %vm1177_vm12, %v1178_v37, %v1176_v27  ;;  %v1209_v24 = vmul.f32 %v1496_v29, %v2695_v15 }
 0x22d   : > { %v1257_v2 = vmax.f32 %v2713_v5, %v2813_v20  ;;  %v1220_v58 = vand.u32 2147483648, %v2719_v12 }
 0x22e   : > { %v1044_v33 = vpop.permute.xlu1 %1043  ;;  %v1042_v16 = vpop.permute.xlu0 %1041  ;;  %v1096_v48 = vmul.f32 %v936_v63, %v936_v63 }
 0x22f   : > { %v1062_v1 = vsel %vm139_vm2, %v1044_v33, 0.0  ;;  %v1061_v50 = vsel %vm139_vm2, %v1042_v16, 0.0  ;;  %v1500_v18 = vpop.eup %1499  ;;  %v1199_v33 = vand.u32 2147483648, %v2679_v40  ;;  %v1162_v16 = vsel %vm1161_vm10, %v2633_v0, %v2731_v32 }
 0x230   : > { %v1078_v9 = vadd.f32 %v1062_v1, %v1014_v8  ;;  %v1077_v55 = vadd.f32 %v1061_v50, %v1013_v53  ;;  %v1095_v53 = vmul.f32 %v935_v39, %v935_v39  ;;  %v1502_v34 = vpop.eup %1501  ;;  %v2805_v1 = vsel %vm1170_vm11, %v1171_v19, %v1169_v22 }
 0x231   : > { %v1183_v50 = vsel %vm1182_vm13, %v2670_v47, %v1181_v28  ;;  %v1202_v32 = vmul.f32 %v1498_v49, %v2703_v11  ;;  %v1197_v19 = vsel %vm1196_vm15, %v2679_v40, %v1195_v21  ;;  %v2833_v37 = vsel %vm1163_vm0, %v1164_v59, %v1162_v16 }
 0x232   : > { %v1110_v31 = vmul.f32 %v1078_v9, %v1078_v9  ;;  %v1048_v45 = vpop.permute.xlu1 %1047  ;;  %v1109_v52 = vmul.f32 %v1077_v55, %v1077_v55  ;;  %v1046_v62 = vpop.permute.xlu0 %1045  ;;  %v1216_v7 = vmul.f32 %v1502_v34, %v2719_v12  ;;  %v2851_v0 = vsel %vm1191_vm3, %v1192_v44, %v1190_v38 }
 0x233   : > { %v1064_v23 = vsel %vm139_vm2, %v1048_v45, 0.0  ;;  %v1063_v60 = vsel %vm139_vm2, %v1046_v62, 0.0  ;;  %vm1198_vm2 = vcmp.eq.f32.partialorder %v2679_v40, 0.0  ;;  %v1204_v55 = vsel %vm1203_vm4, %v2703_v11, %v1202_v32 }
 0x234   : > { %v1126_v25 = vadd.f32 %v1110_v31, %v1094_v14  ;;  %v1080_v41 = vadd.f32 %v1064_v23, %v1016_v26  ;;  %v1125_v51 = vadd.f32 %v1109_v52, %v1093_v17  ;;  %v1079_v30 = vadd.f32 %v1063_v60, %v1015_v3 }
 0x235   : > { %v1223_v3 = vmul.f32 %v1500_v18, %v2709_v6  ;;  %v2842_v26 = vsel %vm1184_vm1, %v1185_v43, %v1183_v50  ;;  %v2855_v59 = vsel %vm1198_vm2, %v1199_v33, %v1197_v19  ;;  %v1206_v47 = vand.u32 2147483648, %v2703_v11 }
 0x236   : > { %v2787_v10 = vadd.f32 1e-08, %v1126_v25  ;;  %v1112_v8 = vmul.f32 %v1080_v41, %v1080_v41  ;;  %v2790_v42 = vadd.f32 1e-08, %v1125_v51  ;;  %v1111_v57 = vmul.f32 %v1079_v30, %v1079_v30 }
 0x237   : > { %v1211_v43 = vsel %vm1210_vm5, %v2695_v15, %v1209_v24  ;;  %v1218_v40 = vsel %vm1217_vm6, %v2719_v12, %v1216_v7  ;;  %v1225_v44 = vsel %vm1224_vm7, %v2709_v6, %v1223_v3  ;;  %v2867_v35 = vsel %vm1205_vm8, %v1206_v47, %v1204_v55 }
 0x238   : > { %1503 = vrsqrt.f32 %v2787_v10  ;;  %v1128_v13 = vadd.f32 %v1112_v8, %v1096_v48  ;;  %v1127_v56 = vadd.f32 %v1111_v57, %v1095_v53  ;;  %v1227_v14 = vand.u32 2147483648, %v2709_v6 }
 0x239   : > { %1505 = vrsqrt.f32 %v2790_v42  ;;  %v2872_v31 = vsel %vm1212_vm9, %v1213_v54, %v1211_v43  ;;  %vm1219_vm10 = vcmp.eq.f32.partialorder %v2719_v12, 0.0  ;;  %vm1226_vm11 = vcmp.eq.f32.partialorder %v2709_v6, 0.0 }
 0x23a   : > { %v2807_v46 = vadd.f32 1e-08, %v1128_v13  ;;  %v2819_v9 = vadd.f32 1e-08, %v1127_v56  ;;  %v1258_v11 = vmax.f32 %v2717_v36, %v2842_v26  ;;  %v2878_v4 = vsel %vm1219_vm10, %v1220_v58, %v1218_v40 }
 0x23b   : > { %v2880_v17 = vsel %vm1226_vm11, %v1227_v14, %v1225_v44  ;;  %v1260_v39 = vmax.f32 %v2805_v1, %v2855_v59  ;;  %vm1238_vm12 = vcmp.eq.f32.partialorder %v2787_v10, inf  ;;  %v1259_v6 = vmax.f32 %v2833_v37, %v2851_v0 }
 0x23c   : > { %1507 = vrsqrt.f32 %v2807_v46  ;;  %v1261_v12 = vmax.f32 %v1257_v2, %v2867_v35  ;;  %vm1231_vm13 = vcmp.eq.f32.partialorder %v2790_v42, inf  ;;  %v1241_v23 = vand.u32 2147483648, %v2787_v10 }
 0x23d   : > { %1509 = vrsqrt.f32 %v2819_v9  ;;  %v1262_v25 = vmax.f32 %v1258_v11, %v2872_v31  ;;  %vm1240_vm14 = vcmp.eq.f32.partialorder %v2787_v10, 0.0  ;;  %v1263_v22 = vmax.f32 %v1259_v6, %v2878_v4 }
 0x23e   : > { %v1264_v51 = vmax.f32 %v1260_v39, %v2880_v17  ;;  %vm1233_vm15 = vcmp.eq.f32.partialorder %v2790_v42, 0.0  ;;  %v1234_v27 = vand.u32 2147483648, %v2790_v42  ;;  %vm1252_vm0 = vcmp.eq.f32.partialorder %v2807_v46, inf }
 0x23f   : > { %vm1254_vm1 = vcmp.eq.f32.partialorder %v2807_v46, 0.0  ;;  %vm1245_vm3 = vcmp.eq.f32.partialorder %v2819_v9, inf  ;;  %v1248_v21 = vand.u32 2147483648, %v2819_v9  ;;  %vm1247_vm2 = vcmp.eq.f32.partialorder %v2819_v9, 0.0 }
 0x242   : > { %v1504_v63 = vpop.eup %1503 }
 0x243   : > { %v1506_v45 = vpop.eup %1505  ;;  %v1237_v15 = vmul.f32 %v1504_v63, %v2787_v10 }
 0x244   : > { %v1230_v52 = vmul.f32 %v1506_v45, %v2790_v42 }
 0x245   : > { %v1239_v62 = vsel %vm1238_vm12, %v2787_v10, %v1237_v15  ;;  %v1255_v10 = vand.u32 2147483648, %v2807_v46 }
 0x246   : > { %v1508_v60 = vpop.eup %1507  ;;  %v1232_v41 = vsel %vm1231_vm13, %v2790_v42, %v1230_v52  ;;  %v1242_v28 = vsel %vm1240_vm14, %v1241_v23, %v1239_v62 }
 0x247   : > { %v1510_v30 = vpop.eup %1509  ;;  %v1251_v29 = vmul.f32 %v1508_v60, %v2807_v46  ;;  %v1235_v8 = vsel %vm1233_vm15, %v1234_v27, %v1232_v41  ;;  %v1266_v57 = vmax.f32 %v1262_v25, %v1242_v28 }
 0x248   : > { %v1244_v48 = vmul.f32 %v1510_v30, %v2819_v9  ;;  %v1265_v13 = vmax.f32 %v1261_v12, %v1235_v8 }
 0x249   : > { %v1253_v49 = vsel %vm1252_vm0, %v2807_v46, %v1251_v29 }
 0x24a   : > { %v1246_v53 = vsel %vm1245_vm3, %v2819_v9, %v1244_v48  ;;  %v1256_v42 = vsel %vm1254_vm1, %v1255_v10, %v1253_v49  ;;  %v1269_v34 = vmax.f32 %v1265_v13, %v1266_v57 }
 0x24b   : > { %v1249_v61 = vsel %vm1247_vm2, %v1248_v21, %v1246_v53  ;;  %v1268_v18 = vmax.f32 %v1264_v51, %v1256_v42 }
 0x24c   : > { %v1267_v33 = vmax.f32 %v1263_v22, %v1249_v61 }
 0x24e   : > { %v1270_v56 = vmax.f32 %v1267_v33, %v1268_v18 }
 0x250   : > { %v1271_v16 = vmax.f32 %v1269_v34, %v1270_v56 }
 0x252   : > { %1272 = vmax.xlane.f32.xlu0 %v1271_v16 }
 0x2df   : > { %v1273_v50 = vpop.xlane.xlu0 %1272 }
 0x2e0   : > { %v1274_v32 = vrot.slane %v1273_v50, 4 }
 0x2e2   : > { %v1275_v38 = vmax.f32 %v1273_v50, %v1274_v32 }
 0x2e4   : > { %v1276_v46 = vrot.slane %v1275_v38, 2 }
 0x2e6   : > { %v1277_v19 = vmax.f32 %v1275_v38, %v1276_v46 }
 0x2e8   : > { %v1278_v24 = vrot.slane %v1277_v19, 1 }
 0x2ea   : > { %v1279_v7 = vmax.f32 %v1277_v19, %v1278_v24 }
 0x2ec   : > { %1420 = vpush %v1279_v7 }
 0x31d   : > { %s1421_s29 = spop %1420 }
 0x31e   : > { %v1281_v9 = vstv %s1421_s29 }
 0x31f   : > { %1511 = vrcp.f32 %v1281_v9 }
 0x329   : > { %v1512_v3 = vpop.eup %1511 }
 0x32a   : > { %1422 = vpush %v1512_v3 }
 0x35b   : > { %s1423_s2 = spop %1422 }
 0x35c   : > { %v1284_v2 = vstv %s1423_s2 }
 0x35d   : > { %v1285_v55 = vmul.f32 %v1284_v2, %v2713_v5  ;;  %v1286_v47 = vmul.f32 %v1284_v2, %v2717_v36  ;;  %v1287_v43 = vmul.f32 %v1284_v2, %v2833_v37  ;;  %v1288_v54 = vmul.f32 %v1284_v2, %v2805_v1 }
 0x35e   : > { %v1289_v40 = vmul.f32 %v1284_v2, %v2813_v20  ;;  %v1290_v44 = vmul.f32 %v1284_v2, %v2842_v26  ;;  %v1291_v58 = vmul.f32 %v1284_v2, %v2851_v0  ;;  %v1292_v14 = vmul.f32 %v1284_v2, %v2855_v59 }
 0x35f   : > { %v1293_v63 = vmul.f32 %v1284_v2, %v2867_v35  ;;  %v1294_v5 = vmul.f32 %v1284_v2, %v2872_v31  ;;  %v1295_v36 = vmul.f32 %v1284_v2, %v2878_v4  ;;  %v1296_v1 = vmul.f32 %v1284_v2, %v2880_v17  ;;  %1301 = vst [vmem:[%s2913_s4] sm:$0xff] %v1285_v55 }
 0x360   : > { %1302 = vst [vmem:[%s2913_s4 + $0x8] sm:$0xff] %v1286_v47  ;;  %1303 = vst [vmem:[%s2913_s4 + $0x10] sm:$0xff] %v1287_v43  ;;  %v1297_v20 = vmul.f32 %v1284_v2, %v1235_v8  ;;  %v1298_v37 = vmul.f32 %v1284_v2, %v1242_v28  ;;  %v1299_v26 = vmul.f32 %v1284_v2, %v1249_v61 }
 0x361   : > { %1304 = vst [vmem:[%s2913_s4 + $0x18] sm:$0xff] %v1288_v54  ;;  %v1300_v0 = vmul.f32 %v1284_v2, %v1256_v42  ;;  %1305 = vst [vmem:[%s2913_s4 + $0x20] sm:$0xff] %v1289_v40 }
 0x362   : > { %1306 = vst [vmem:[%s2913_s4 + $0x28] sm:$0xff] %v1290_v44  ;;  %1307 = vst [vmem:[%s2913_s4 + $0x30] sm:$0xff] %v1291_v58 }
 0x363   : > { %1308 = vst [vmem:[%s2913_s4 + $0x38] sm:$0xff] %v1292_v14  ;;  %1309 = vst [vmem:[%s2913_s4 + $0x40] sm:$0xff] %v1293_v63 }
 0x364   : > { %1310 = vst [vmem:[%s2913_s4 + $0x48] sm:$0xff] %v1294_v5  ;;  %1311 = vst [vmem:[%s2913_s4 + $0x50] sm:$0xff] %v1295_v36 }
 0x365   : > { %1312 = vst [vmem:[%s2913_s4 + $0x58] sm:$0xff] %v1296_v1  ;;  %1313 = vst [vmem:[%s2913_s4 + $0x60] sm:$0xff] %v1297_v20 }
 0x366   : > { %1314 = vst [vmem:[%s2913_s4 + $0x68] sm:$0xff] %v1298_v37  ;;  %1315 = vst [vmem:[%s2913_s4 + $0x70] sm:$0xff] %v1299_v26 }
 0x367   : > { %1316 = vst [vmem:[%s2913_s4 + $0x78] sm:$0xff] %v1300_v0 }
 0x368   : > { %1556 = shalt.err (!%p1553_p2)
}
 0x369   : > { %s1557_s24 = scalar_lea.hbm %s2935_s13, 2048  ;;  %s1561_s25 = scalar_lea.hbm %s2994_s1, 4096 }
 0x36a   : > { %p1558_p4 = scmp.ne.s32.totalorder %s2935_s13, %s1557_s24  ;;  %p1562_p9 = scmp.lt.u32.totalorder %s2935_s13, %s2994_s1 }
 0x36b   : > { %p1563_p1 = scmp.lt.u32.totalorder %s1561_s25, %s1557_s24  ;;  %p1565_p6 = scmp.lt.u32.totalorder %s1557_s24, %s2935_s13 }
 0x36c   : > { %p1559_p5 = pnand %p1558_p4, %p3007_p11 }
 0x36d   : > { %p1564_p3 = por %p1563_p1, %p1562_p9 }
 0x36e   : > { %p1560_p7 = pneg %p1559_p5 }
 0x36f   : > { %p1566_p12 = por %p1565_p6, %p1564_p3 }
 0x371   : > { %p1567_p13 = pnand %p1566_p12, %p1560_p7 }
 0x373   : > { %1570 = shalt.err (!%p1567_p13)
}
 0x374   : > { %s1620_s28 = smov 128   ;;  %s1621_s29 = smov 8  }
 0x375   : > { %1426 = dma.vmem_to_hbm [thread:$0]  (%p3007_p11), %s2937_s5, 2048, %s2935_s13, %s1318_s14, %s1620_s28, %s1620_s28, %s1621_s29  }
 0x376 PF: > { %s1346_s2 = sand.u32 1, %s1597_s6   ;;  %p3008_p8 = scmp.ne.s32.totalorder %s3001_s19, 0 }
 0x377   : > { %p3009_p10 = scmp.ge.s32.totalorder %s1609_s9, 2  ;;  %s1347_s3 = scalar_lea.sflag [#allocation6], %s1346_s2 }
 0x379   : > { %p1433_p0 = pnand %p3009_p10, %p3008_p8 }
 0x37b   : > { %1592 = dma.done.wait (!%p1433_p0), %s1347_s3, 2048  }
 0x37c   : > { %1594 = vsyncadd (!%p1433_p0), %s1347_s3, 4294965248  ;;  %p14_p2 = scmp.ge.s32.totalorder %s1657_s12, 4   ;;  %s3010_s6 = smov %s1601_s7 }
 0x37d   : > { %s3011_s7 = smov %s1605_s8  ;;  %s3012_s8 = smov %s1669_s15 }
 0x37e   : > { %s3013_s9 = smov %s1657_s12  ;;  %16 = sbr.rel (!%p14_p2) target bundleno = 5 (0x5), region = 69 }
 0x385   :  { %1352 = vsyncpa [#allocation5], 1 }
 0x386   :  { %1354 = vsyncpa [#allocation5 + $0x1], 1 }
 0x387   :  { %1355 = vsyncpa [#allocation6], 1 }
 0x388   :  { %1357 = vsyncpa [#allocation6 + $0x1], 1 }

</bundles_post_ra>
